<compile_context>
chip_gen: v6e
topology: v6e:2x2x1
jax: 0.10.0
libtpu: 0.0.40
codegen_flags: <defaults>
</compile_context>

<pallas_src>
import functools
import re

import jax
import jax.numpy as jnp
from jax import lax
from jax.experimental import pallas as pl
from jax.experimental.pallas import tpu as pltpu


def _round_up(a, b):
    return ((a + b - 1) // b) * b


def _cdiv(a, b):
    return (a + b - 1) // b


def _tpu_env():
    """Best-effort (generation, vmem_capacity_bytes, tensorcores_per_chip)."""
    gen = 0
    try:
        kind = jax.devices()[0].device_kind or ""
    except Exception:
        kind = ""
    m = re.search(r"(\d+)", kind)
    if m:
        gen = int(m.group(1))
    vmem_cap = None
    try:
        info = pltpu.get_tpu_info()
        vmem_cap = int(info.vmem_capacity_bytes)
    except Exception:
        vmem_cap = None
    if not vmem_cap or vmem_cap <= 0:
        vmem_cap = (64 << 20) if gen >= 7 else (128 << 20)
    num_tc = 2 if gen >= 7 else 1
    return gen, vmem_cap, num_tc


def _default_vmem_limit(vmem_cap):
    if vmem_cap >= (100 << 20):
        return 100 << 20                     # v5e / v6e: 128 MiB physical
    # v7x-class (64 MiB physical): leave ~8 MiB headroom for compiler scratch.
    return max(32 << 20, min((vmem_cap * 7) // 8, vmem_cap - (8 << 20)))


def _choose_row_tile(m, requested, align, num_tc):
    """Row tile: multiple of `align`, close to `requested`.  On single-TC chips
    keep one full-M step when it fits (grid is a serial loop there); on 2-TC
    chips make the 'parallel' axis have an even step count >= 2."""
    rt = max(align, min(_round_up(requested, align), _round_up(m, align)))
    if num_tc >= 2:
        steps = _cdiv(m, rt)
        if steps < 2:
            half = _round_up(_cdiv(m, 2), align)
            if half >= align and _cdiv(m, half) >= 2:
                rt = half
        steps = _cdiv(m, rt)
        if steps > 1 and steps % 2 == 1:
            rt2 = _round_up(_cdiv(m, steps + 1), align)
            if rt2 >= align and _cdiv(m, rt2) % 2 == 0:
                rt = rt2
    return rt


def _encoder_kernel(x_ref, w1_ref, b1_ref, w2_ref, b2_ref, w3_ref, b3_ref,
                    o_ref, *, precision):
    # x_ref: (row_tile, in_size) tile of flattened input rows (f32 or bf16).
    # GEMMs accumulate in f32 on the MXU; bias-add + ReLU stay f32 on the VPU.
    x = x_ref[...]

    h = jnp.dot(x, w1_ref[...], preferred_element_type=jnp.float32,
                precision=precision)
    h = jnp.maximum(h + b1_ref[...], 0.0)

    h = jnp.dot(h.astype(w2_ref.dtype), w2_ref[...],
                preferred_element_type=jnp.float32, precision=precision)
    h = jnp.maximum(h + b2_ref[...], 0.0)

    h = jnp.dot(h.astype(w3_ref.dtype), w3_ref[...],
                preferred_element_type=jnp.float32, precision=precision)
    h = jnp.maximum(h + b3_ref[...], 0.0)

    o_ref[...] = h.astype(o_ref.dtype)


def encoder_forward(x, params, *, row_tile=512, compute_dtype=None,
                    out_dtype=None, return_padded=False, vmem_limit_bytes=None):
    """x: (..., input_size).  params: dict of W1,b1,W2,b2,W3,b3.

    compute_dtype: None = auto (bf16 on bf16-native MXUs / when f32 weights
    don't fit VMEM, else f32 with explicit HIGHEST precision).
    out_dtype: None keeps x.dtype; pass jnp.bfloat16 to halve store traffic.
    return_padded: return the lane-padded (.., round_up(out,128)) buffer and
    skip the post-kernel slice (for fused downstream consumers).
    """
    w1, b1 = params["W1"], params["b1"]
    w2, b2 = params["W2"], params["b2"]
    w3, b3 = params["W3"], params["b3"]

    in_size, hid_size = w1.shape
    out_size = w3.shape[1]

    orig_shape = x.shape
    out_dt = jnp.dtype(out_dtype) if out_dtype is not None else jnp.dtype(x.dtype)

    gen, vmem_cap, num_tc = _tpu_env()
    if vmem_limit_bytes is None:
        vmem_limit_bytes = _default_vmem_limit(vmem_cap)

    # Lane-pad the hidden and output fan-outs to multiples of 128 so the inner
    # GEMMs use full MXU columns and all stores are unmasked full-lane vst.
    hid_p = _round_up(hid_size, 128)
    out_p = _round_up(out_size, 128)

    weight_elems = in_size * hid_p + hid_p * hid_p + hid_p * out_p
    if compute_dtype is None:
        use_bf16 = (gen >= 6) or (weight_elems * 4 > 0.6 * vmem_limit_bytes)
        cdt = jnp.dtype(jnp.bfloat16) if use_bf16 else jnp.dtype(jnp.float32)
    else:
        cdt = jnp.dtype(compute_dtype)
    # TODO(synk): when even bf16 weights exceed the VMEM budget (hid ~> 6k on
    # v7x), add a K-tiled layer-2 path (extra 'arbitrary' grid axis over hid
    # with a VMEM accumulator + pl.when init/finalize), or an fp8 weight path
    # with per-channel scales in the f32 epilogue.

    # Explicit precision for the f32 path so reduced-precision MXU passes are
    # never used silently; bf16 path uses the default (bf16-native MXU).
    prec = lax.Precision.HIGHEST if cdt == jnp.dtype(jnp.float32) else None

    # Flatten leading dims. No row padding: ragged tail tiles are masked by
    # Pallas (loads padded, stores skipped), so no extra HBM copy of x.
    x2d = x.reshape(-1, in_size).astype(cdt)
    m = x2d.shape[0]

    def pad2(a, r, c):
        return jnp.pad(a, ((0, r - a.shape[0]), (0, c - a.shape[1])))

    w1p = pad2(w1, in_size, hid_p).astype(cdt)
    w2p = pad2(w2, hid_p, hid_p).astype(cdt)
    w3p = pad2(w3, hid_p, out_p).astype(cdt)
    # Biases stay f32 (added to the f32 accumulator on the VPU).
    b1p = jnp.pad(b1, (0, hid_p - hid_size)).reshape(1, hid_p).astype(jnp.float32)
    b2p = jnp.pad(b2, (0, hid_p - hid_size)).reshape(1, hid_p).astype(jnp.float32)
    b3p = jnp.pad(b3, (0, out_p - out_size)).reshape(1, out_p).astype(jnp.float32)

    row_align = 16 if cdt == jnp.dtype(jnp.bfloat16) else 8
    rt = _choose_row_tile(m, row_tile, row_align, num_tc)

    # Shrink the row tile if (resident weights + pipelined x/out tiles + f32
    # intermediates) would exceed the VMEM budget.
    w_bytes = weight_elems * cdt.itemsize + (2 * hid_p + out_p) * 4

    def tile_bytes(r):
        return (2 * r * in_size * cdt.itemsize            # x (double-buffered)
                + 2 * r * out_p * out_dt.itemsize         # out (double-buffered)
                + 2 * r * hid_p * 4 + r * out_p * 4)      # f32 intermediates

    while rt > row_align and w_bytes + tile_bytes(rt) > 0.9 * vmem_limit_bytes:
        rt = max(row_align, _round_up(rt // 2, row_align))
        if rt == row_align:
            break

    grid = (_cdiv(m, rt),)

    itemsize = cdt.itemsize
    flops = 2 * m * (in_size * hid_p + hid_p * hid_p + hid_p * out_p)
    bytes_accessed = (m * in_size * itemsize + weight_elems * itemsize
                      + (2 * hid_p + out_p) * 4 + m * out_p * out_dt.itemsize)

    kernel = functools.partial(_encoder_kernel, precision=prec)

    def build_and_call(single_buffer_weights):
        # Constant-index operands (weights/biases) are resident across the
        # grid: single-buffer them so Pallas doesn't allocate a useless second
        # VMEM buffer for each.
        if single_buffer_weights and hasattr(pl, "Buffered"):
            const_kw = dict(pipeline_mode=pl.Buffered(1))
        else:
            const_kw = {}

        def const_spec(shape):
            return pl.BlockSpec(shape, lambda i: (0, 0), **const_kw)

        in_specs = [
            pl.BlockSpec((rt, in_size), lambda i: (i, 0)),   # x rows (pipelined)
            const_spec((in_size, hid_p)),                    # W1 (resident)
            const_spec((1, hid_p)),                          # b1
            const_spec((hid_p, hid_p)),                      # W2
            const_spec((1, hid_p)),                          # b2
            const_spec((hid_p, out_p)),                      # W3 (lane-padded)
            const_spec((1, out_p)),                          # b3
        ]
        out_spec = pl.BlockSpec((rt, out_p), lambda i: (i, 0))

        return pl.pallas_call(
            kernel,
            out_shape=jax.ShapeDtypeStruct((m, out_p), out_dt),
            grid_spec=pltpu.PrefetchScalarGridSpec(
                num_scalar_prefetch=0,
                grid=grid,
                in_specs=in_specs,
                out_specs=out_spec,
            ),
            compiler_params=pltpu.CompilerParams(
                dimension_semantics=("parallel",),
                vmem_limit_bytes=int(vmem_limit_bytes),
            ),
            cost_estimate=pl.CostEstimate(
                flops=int(flops),
                transcendentals=0,
                bytes_accessed=int(bytes_accessed),
            ),
        )(x2d, w1p, b1p, w2p, b2p, w3p, b3p)

    try:
        out = build_and_call(True)    # single-buffered resident weights
    except Exception:
        out = build_and_call(False)   # fallback: default double-buffering

    if return_padded:
        return out.reshape(tuple(orig_shape[:-1]) + (out.shape[-1],))
    if out_p != out_size:
        out = out[:, :out_size]
    return out.reshape(tuple(orig_shape[:-1]) + (out_size,))


def init_params(key, input_size, hidden_size, output_size):
    """Deterministic init mimicking nn.Linear (uniform in +/-1/sqrt(fan_in))."""
    ks = jax.random.split(key, 6)

    def lin(kw, kb, fan_in, fan_out):
        bound = 1.0 / jnp.sqrt(fan_in)
        w = jax.random.uniform(kw, (fan_in, fan_out), jnp.float32, -bound, bound)
        b = jax.random.uniform(kb, (fan_out,), jnp.float32, -bound, bound)
        return w, b

    w1, b1 = lin(ks[0], ks[1], input_size, hidden_size)
    w2, b2 = lin(ks[2], ks[3], hidden_size, hidden_size)
    w3, b3 = lin(ks[4], ks[5], hidden_size, output_size)
    return {"W1": w1, "b1": b1, "W2": w2, "b2": b2, "W3": w3, "b3": b3}


def encoder_reference(x, params):
    """Pure-JAX reference for correctness checking."""
    s = x.shape
    h = x.reshape(-1, s[-1])
    h = jnp.maximum(h @ params["W1"] + params["b1"], 0.0)
    h = jnp.maximum(h @ params["W2"] + params["b2"], 0.0)
    h = jnp.maximum(h @ params["W3"] + params["b3"], 0.0)
    return h.reshape(tuple(s[:-1]) + (-1,))


if __name__ == "__main__":
    input_size, hidden_size, output_size = 16, 32, 24
    batch, seq = 2, 8  # leading dims; flattened rows = 16

    key = jax.random.PRNGKey(0)
    kx, kp = jax.random.split(key)
    x = jax.random.normal(kx, (batch, seq, input_size), jnp.float32)
    params = init_params(kp, input_size, hidden_size, output_size)

    ref = encoder_reference(x, params)

    # Explicit f32 path (HIGHEST precision GEMM) — matches reference closely.
    out_f32 = jax.block_until_ready(
        encoder_forward(x, params, compute_dtype=jnp.float32))
    assert out_f32.shape == (batch, seq, output_size), out_f32.shape
    assert jnp.allclose(out_f32, ref, atol=1e-4, rtol=1e-4), "f32 mismatch vs reference"

    # Explicit bf16 MXU path (bf16 weights/activations, f32 accumulation).
    out_bf16 = jax.block_until_ready(
        encoder_forward(x, params, compute_dtype=jnp.bfloat16))
    assert out_bf16.shape == (batch, seq, output_size), out_bf16.shape
    assert jnp.allclose(out_bf16, ref, atol=5e-2, rtol=5e-2), "bf16 mismatch vs reference"

    # Auto (generation-aware) path: bf16 on v6e/v7x, f32 otherwise.
    out_auto = jax.block_until_ready(encoder_forward(x, params))
    assert out_auto.shape == (batch, seq, output_size), out_auto.shape
    assert jnp.allclose(out_auto, ref, atol=5e-2, rtol=5e-2), "auto mismatch vs reference"

    print("KERNEL_OK")
</pallas_src>

<mosaic_0001>
module attributes {stable_mosaic.version = 11 : i64} {
  func.func @_encoder_kernel(%arg0: i32, %arg1: memref<16x16xf32, #tpu.memory_space<vmem>>, %arg2: memref<16x128xf32, #tpu.memory_space<vmem>>, %arg3: memref<1x128xf32, #tpu.memory_space<vmem>>, %arg4: memref<128x128xf32, #tpu.memory_space<vmem>>, %arg5: memref<1x128xf32, #tpu.memory_space<vmem>>, %arg6: memref<128x128xf32, #tpu.memory_space<vmem>>, %arg7: memref<1x128xf32, #tpu.memory_space<vmem>>, %arg8: memref<16x128xf32, #tpu.memory_space<vmem>>) attributes {dimension_semantics = [#tpu.dimension_semantics<parallel>], iteration_bounds = array<i64: 1>, scalar_prefetch = 0 : i64, scratch_operands = 0 : i64, tpu.core_type = #tpu.core_type<tc>, window_params = [{transform_indices = @transform_0, window_bounds = array<i64: 16, 16>}, {pipeline_mode = #tpu.pipeline_mode<synchronous>, transform_indices = @transform_1, window_bounds = array<i64: 16, 128>}, {pipeline_mode = #tpu.pipeline_mode<synchronous>, transform_indices = @transform_2, window_bounds = array<i64: 1, 128>}, {pipeline_mode = #tpu.pipeline_mode<synchronous>, transform_indices = @transform_3, window_bounds = array<i64: 128, 128>}, {pipeline_mode = #tpu.pipeline_mode<synchronous>, transform_indices = @transform_4, window_bounds = array<i64: 1, 128>}, {pipeline_mode = #tpu.pipeline_mode<synchronous>, transform_indices = @transform_5, window_bounds = array<i64: 128, 128>}, {pipeline_mode = #tpu.pipeline_mode<synchronous>, transform_indices = @transform_6, window_bounds = array<i64: 1, 128>}, {transform_indices = @transform_7, window_bounds = array<i64: 16, 128>}]} {
    %c0 = arith.constant 0 : index
    %c0_0 = arith.constant 0 : index
    %0 = vector.load %arg1[%c0, %c0_0] : memref<16x16xf32, #tpu.memory_space<vmem>>, vector<16x16xf32>
    %c0_1 = arith.constant 0 : index
    %c0_2 = arith.constant 0 : index
    %1 = vector.load %arg2[%c0_1, %c0_2] : memref<16x128xf32, #tpu.memory_space<vmem>>, vector<16x128xf32>
    %cst = arith.constant dense<0.000000e+00> : vector<16x128xf32>
    %2 = tpu.matmul %0, %1, %cst {dimension_numbers = #tpu.dot_dimension_numbers<[1], [0], [0], [1], [0, 0, 1, 1], [], []>, precision = #tpu.contract_precision<fp32>} : vector<16x16xf32>, vector<16x128xf32>, vector<16x128xf32> -> vector<16x128xf32>
    %c0_3 = arith.constant 0 : index
    %c0_4 = arith.constant 0 : index
    %3 = vector.load %arg3[%c0_3, %c0_4] : memref<1x128xf32, #tpu.memory_space<vmem>>, vector<1x128xf32>
    %4 = vector.broadcast %3 : vector<1x128xf32> to vector<16x128xf32>
    %5 = arith.addf %2, %4 : vector<16x128xf32>
    %cst_5 = arith.constant 0.000000e+00 : f32
    %6 = vector.broadcast %cst_5 : f32 to vector<16x128xf32>
    %7 = arith.maximumf %5, %6 : vector<16x128xf32>
    %c0_6 = arith.constant 0 : index
    %c0_7 = arith.constant 0 : index
    %8 = vector.load %arg4[%c0_6, %c0_7] : memref<128x128xf32, #tpu.memory_space<vmem>>, vector<128x128xf32>
    %cst_8 = arith.constant dense<0.000000e+00> : vector<16x128xf32>
    %9 = tpu.matmul %7, %8, %cst_8 {dimension_numbers = #tpu.dot_dimension_numbers<[1], [0], [0], [1], [0, 0, 1, 1], [], []>, precision = #tpu.contract_precision<fp32>} : vector<16x128xf32>, vector<128x128xf32>, vector<16x128xf32> -> vector<16x128xf32>
    %c0_9 = arith.constant 0 : index
    %c0_10 = arith.constant 0 : index
    %10 = vector.load %arg5[%c0_9, %c0_10] : memref<1x128xf32, #tpu.memory_space<vmem>>, vector<1x128xf32>
    %11 = vector.broadcast %10 : vector<1x128xf32> to vector<16x128xf32>
    %12 = arith.addf %9, %11 : vector<16x128xf32>
    %cst_11 = arith.constant 0.000000e+00 : f32
    %13 = vector.broadcast %cst_11 : f32 to vector<16x128xf32>
    %14 = arith.maximumf %12, %13 : vector<16x128xf32>
    %c0_12 = arith.constant 0 : index
    %c0_13 = arith.constant 0 : index
    %15 = vector.load %arg6[%c0_12, %c0_13] : memref<128x128xf32, #tpu.memory_space<vmem>>, vector<128x128xf32>
    %cst_14 = arith.constant dense<0.000000e+00> : vector<16x128xf32>
    %16 = tpu.matmul %14, %15, %cst_14 {dimension_numbers = #tpu.dot_dimension_numbers<[1], [0], [0], [1], [0, 0, 1, 1], [], []>, precision = #tpu.contract_precision<fp32>} : vector<16x128xf32>, vector<128x128xf32>, vector<16x128xf32> -> vector<16x128xf32>
    %c0_15 = arith.constant 0 : index
    %c0_16 = arith.constant 0 : index
    %17 = vector.load %arg7[%c0_15, %c0_16] : memref<1x128xf32, #tpu.memory_space<vmem>>, vector<1x128xf32>
    %18 = vector.broadcast %17 : vector<1x128xf32> to vector<16x128xf32>
    %19 = arith.addf %16, %18 : vector<16x128xf32>
    %cst_17 = arith.constant 0.000000e+00 : f32
    %20 = vector.broadcast %cst_17 : f32 to vector<16x128xf32>
    %21 = arith.maximumf %19, %20 : vector<16x128xf32>
    %c0_18 = arith.constant 0 : index
    %c0_19 = arith.constant 0 : index
    %22 = vector.load %arg8[%c0_18, %c0_19] : memref<16x128xf32, #tpu.memory_space<vmem>>, vector<16x128xf32>
    tpu.vector_store %arg8[%c0_18, %c0_19], %21 {strides = array<i32>} : memref<16x128xf32, #tpu.memory_space<vmem>>, vector<16x128xf32>,
    return
  }
  func.func @transform_0(%arg0: i32) -> (i32, i32) {
    %c0_i32 = arith.constant 0 : i32
    %c0_i32_0 = arith.constant 0 : i32
    return %arg0, %c0_i32 : i32, i32
  }
  func.func @transform_1(%arg0: i32) -> (i32, i32) {
    %c0_i32 = arith.constant 0 : i32
    %c0_i32_0 = arith.constant 0 : i32
    %c0_i32_1 = arith.constant 0 : i32
    return %c0_i32, %c0_i32_0 : i32, i32
  }
  func.func @transform_2(%arg0: i32) -> (i32, i32) {
    %c0_i32 = arith.constant 0 : i32
    %c0_i32_0 = arith.constant 0 : i32
    %c0_i32_1 = arith.constant 0 : i32
    return %c0_i32, %c0_i32_0 : i32, i32
  }
  func.func @transform_3(%arg0: i32) -> (i32, i32) {
    %c0_i32 = arith.constant 0 : i32
    %c0_i32_0 = arith.constant 0 : i32
    %c0_i32_1 = arith.constant 0 : i32
    return %c0_i32, %c0_i32_0 : i32, i32
  }
  func.func @transform_4(%arg0: i32) -> (i32, i32) {
    %c0_i32 = arith.constant 0 : i32
    %c0_i32_0 = arith.constant 0 : i32
    %c0_i32_1 = arith.constant 0 : i32
    return %c0_i32, %c0_i32_0 : i32, i32
  }
  func.func @transform_5(%arg0: i32) -> (i32, i32) {
    %c0_i32 = arith.constant 0 : i32
    %c0_i32_0 = arith.constant 0 : i32
    %c0_i32_1 = arith.constant 0 : i32
    return %c0_i32, %c0_i32_0 : i32, i32
  }
  func.func @transform_6(%arg0: i32) -> (i32, i32) {
    %c0_i32 = arith.constant 0 : i32
    %c0_i32_0 = arith.constant 0 : i32
    %c0_i32_1 = arith.constant 0 : i32
    return %c0_i32, %c0_i32_0 : i32, i32
  }
  func.func @transform_7(%arg0: i32) -> (i32, i32) {
    %c0_i32 = arith.constant 0 : i32
    %c0_i32_0 = arith.constant 0 : i32
    return %arg0, %c0_i32 : i32, i32
  }
}

module attributes {stable_mosaic.version = 11 : i64} {
  func.func @_encoder_kernel(%arg0: i32, %arg1: memref<16x16xf32, #tpu.memory_space<vmem>>, %arg2: memref<16x128xf32, #tpu.memory_space<vmem>>, %arg3: memref<1x128xf32, #tpu.memory_space<vmem>>, %arg4: memref<128x128xf32, #tpu.memory_space<vmem>>, %arg5: memref<1x128xf32, #tpu.memory_space<vmem>>, %arg6: memref<128x128xf32, #tpu.memory_space<vmem>>, %arg7: memref<1x128xf32, #tpu.memory_space<vmem>>, %arg8: memref<16x128xf32, #tpu.memory_space<vmem>>) attributes {dimension_semantics = [#tpu.dimension_semantics<parallel>], iteration_bounds = array<i64: 1>, scalar_prefetch = 0 : i64, scratch_operands = 0 : i64, tpu.core_type = #tpu.core_type<tc>, window_params = [{transform_indices = @transform_0, window_bounds = array<i64: 16, 16>}, {pipeline_mode = #tpu.pipeline_mode<synchronous>, transform_indices = @transform_1, window_bounds = array<i64: 16, 128>}, {pipeline_mode = #tpu.pipeline_mode<synchronous>, transform_indices = @transform_2, window_bounds = array<i64: 1, 128>}, {pipeline_mode = #tpu.pipeline_mode<synchronous>, transform_indices = @transform_3, window_bounds = array<i64: 128, 128>}, {pipeline_mode = #tpu.pipeline_mode<synchronous>, transform_indices = @transform_4, window_bounds = array<i64: 1, 128>}, {pipeline_mode = #tpu.pipeline_mode<synchronous>, transform_indices = @transform_5, window_bounds = array<i64: 128, 128>}, {pipeline_mode = #tpu.pipeline_mode<synchronous>, transform_indices = @transform_6, window_bounds = array<i64: 1, 128>}, {transform_indices = @transform_7, window_bounds = array<i64: 16, 128>}]} {
    %c0 = arith.constant 0 : index
    %c0_0 = arith.constant 0 : index
    %0 = vector.load %arg1[%c0, %c0_0] : memref<16x16xf32, #tpu.memory_space<vmem>>, vector<16x16xf32>
    %c0_1 = arith.constant 0 : index
    %c0_2 = arith.constant 0 : index
    %1 = vector.load %arg2[%c0_1, %c0_2] : memref<16x128xf32, #tpu.memory_space<vmem>>, vector<16x128xf32>
    %cst = arith.constant dense<0.000000e+00> : vector<16x128xf32>
    %2 = tpu.matmul %0, %1, %cst {dimension_numbers = #tpu.dot_dimension_numbers<[1], [0], [0], [1], [0, 0, 1, 1], [], []>, precision = #tpu.contract_precision<fp32>} : vector<16x16xf32>, vector<16x128xf32>, vector<16x128xf32> -> vector<16x128xf32>
    %c0_3 = arith.constant 0 : index
    %c0_4 = arith.constant 0 : index
    %3 = vector.load %arg3[%c0_3, %c0_4] : memref<1x128xf32, #tpu.memory_space<vmem>>, vector<1x128xf32>
    %4 = vector.broadcast %3 : vector<1x128xf32> to vector<16x128xf32>
    %5 = arith.addf %2, %4 : vector<16x128xf32>
    %cst_5 = arith.constant 0.000000e+00 : f32
    %6 = vector.broadcast %cst_5 : f32 to vector<16x128xf32>
    %7 = arith.maximumf %5, %6 : vector<16x128xf32>
    %c0_6 = arith.constant 0 : index
    %c0_7 = arith.constant 0 : index
    %8 = vector.load %arg4[%c0_6, %c0_7] : memref<128x128xf32, #tpu.memory_space<vmem>>, vector<128x128xf32>
    %cst_8 = arith.constant dense<0.000000e+00> : vector<16x128xf32>
    %9 = tpu.matmul %7, %8, %cst_8 {dimension_numbers = #tpu.dot_dimension_numbers<[1], [0], [0], [1], [0, 0, 1, 1], [], []>, precision = #tpu.contract_precision<fp32>} : vector<16x128xf32>, vector<128x128xf32>, vector<16x128xf32> -> vector<16x128xf32>
    %c0_9 = arith.constant 0 : index
    %c0_10 = arith.constant 0 : index
    %10 = vector.load %arg5[%c0_9, %c0_10] : memref<1x128xf32, #tpu.memory_space<vmem>>, vector<1x128xf32>
    %11 = vector.broadcast %10 : vector<1x128xf32> to vector<16x128xf32>
    %12 = arith.addf %9, %11 : vector<16x128xf32>
    %cst_11 = arith.constant 0.000000e+00 : f32
    %13 = vector.broadcast %cst_11 : f32 to vector<16x128xf32>
    %14 = arith.maximumf %12, %13 : vector<16x128xf32>
    %c0_12 = arith.constant 0 : index
    %c0_13 = arith.constant 0 : index
    %15 = vector.load %arg6[%c0_12, %c0_13] : memref<128x128xf32, #tpu.memory_space<vmem>>, vector<128x128xf32>
    %cst_14 = arith.constant dense<0.000000e+00> : vector<16x128xf32>
    %16 = tpu.matmul %14, %15, %cst_14 {dimension_numbers = #tpu.dot_dimension_numbers<[1], [0], [0], [1], [0, 0, 1, 1], [], []>, precision = #tpu.contract_precision<fp32>} : vector<16x128xf32>, vector<128x128xf32>, vector<16x128xf32> -> vector<16x128xf32>
    %c0_15 = arith.constant 0 : index
    %c0_16 = arith.constant 0 : index
    %17 = vector.load %arg7[%c0_15, %c0_16] : memref<1x128xf32, #tpu.memory_space<vmem>>, vector<1x128xf32>
    %18 = vector.broadcast %17 : vector<1x128xf32> to vector<16x128xf32>
    %19 = arith.addf %16, %18 : vector<16x128xf32>
    %cst_17 = arith.constant 0.000000e+00 : f32
    %20 = vector.broadcast %cst_17 : f32 to vector<16x128xf32>
    %21 = arith.maximumf %19, %20 : vector<16x128xf32>
    %c0_18 = arith.constant 0 : index
    %c0_19 = arith.constant 0 : index
    %22 = vector.load %arg8[%c0_18, %c0_19] : memref<16x128xf32, #tpu.memory_space<vmem>>, vector<16x128xf32>
    tpu.vector_store %arg8[%c0_18, %c0_19], %21 {strides = array<i32>} : memref<16x128xf32, #tpu.memory_space<vmem>>, vector<16x128xf32>,
    return
  }
  func.func @transform_0(%arg0: i32) -> (i32, i32) {
    %c0_i32 = arith.constant 0 : i32
    %c0_i32_0 = arith.constant 0 : i32
    return %arg0, %c0_i32 : i32, i32
  }
  func.func @transform_1(%arg0: i32) -> (i32, i32) {
    %c0_i32 = arith.constant 0 : i32
    %c0_i32_0 = arith.constant 0 : i32
    %c0_i32_1 = arith.constant 0 : i32
    return %c0_i32, %c0_i32_0 : i32, i32
  }
  func.func @transform_2(%arg0: i32) -> (i32, i32) {
    %c0_i32 = arith.constant 0 : i32
    %c0_i32_0 = arith.constant 0 : i32
    %c0_i32_1 = arith.constant 0 : i32
    return %c0_i32, %c0_i32_0 : i32, i32
  }
  func.func @transform_3(%arg0: i32) -> (i32, i32) {
    %c0_i32 = arith.constant 0 : i32
    %c0_i32_0 = arith.constant 0 : i32
    %c0_i32_1 = arith.constant 0 : i32
    return %c0_i32, %c0_i32_0 : i32, i32
  }
  func.func @transform_4(%arg0: i32) -> (i32, i32) {
    %c0_i32 = arith.constant 0 : i32
    %c0_i32_0 = arith.constant 0 : i32
    %c0_i32_1 = arith.constant 0 : i32
    return %c0_i32, %c0_i32_0 : i32, i32
  }
  func.func @transform_5(%arg0: i32) -> (i32, i32) {
    %c0_i32 = arith.constant 0 : i32
    %c0_i32_0 = arith.constant 0 : i32
    %c0_i32_1 = arith.constant 0 : i32
    return %c0_i32, %c0_i32_0 : i32, i32
  }
  func.func @transform_6(%arg0: i32) -> (i32, i32) {
    %c0_i32 = arith.constant 0 : i32
    %c0_i32_0 = arith.constant 0 : i32
    %c0_i32_1 = arith.constant 0 : i32
    return %c0_i32, %c0_i32_0 : i32, i32
  }
  func.func @transform_7(%arg0: i32) -> (i32, i32) {
    %c0_i32 = arith.constant 0 : i32
    %c0_i32_0 = arith.constant 0 : i32
    return %arg0, %c0_i32 : i32, i32
  }
}

</mosaic_0001>

<bundles_post_ra>
// kernel: tpu_custom_call.1
= control target key start
LH: loop header
LB: loop body
LE: loop exit
PB: predicated region body
PF: predicated region fallthrough
CT: control target
= control target key end

     0   :  { %12 = vsyncpa [#allocation3], 0  ;;  %s3661_s0 = inlined_call_operand.hbm [shape: f32[16,16], index: 0, kind: input, shape index: {}]   ;;  %s3662_s1 = inlined_call_operand.hbm [shape: f32[16,128], index: 1, kind: input, shape index: {}]   ;;  %s3663_s2 = inlined_call_operand.vmem [shape: f32[1,128], index: 2, kind: input, shape index: {}]   ;;  %s3664_s3 = inlined_call_operand.hbm [shape: f32[128,128], index: 3, kind: input, shape index: {}]   ;;  %s3665_s4 = inlined_call_operand.vmem [shape: f32[1,128], index: 4, kind: input, shape index: {}]   ;;  %s3666_s5 = inlined_call_operand.hbm [shape: f32[128,128], index: 5, kind: input, shape index: {}]   ;;  %s3667_s6 = inlined_call_operand.vmem [shape: f32[1,128], index: 6, kind: input, shape index: {}]   ;;  %s3668_s7 = inlined_call_operand.hbm [shape: f32[16,128], index: 7, kind: output, shape index: {}]  }
   0x1   :  { %13 = vsyncpa [#allocation6], 0 }
   0x2   :  { %14 = vsyncpa [#allocation9], 0 }
   0x3   :  { %15 = vsyncpa [#allocation4], 0  ;;  %s2863_s24 = smov [#allocation5]   ;;  %s2864_s26 = smov [#allocation2]  }
   0x4   :  { %s33_s25 = sshll.u32 %s2863_s24, 4  ;;  %s21_s27 = sshll.u32 %s2864_s26, 4  ;;  %s34_s25 = int_to_ptr.vmem [resolvable:$true] %s33_s25  ;;  %s22_s27 = int_to_ptr.vmem [resolvable:$true] %s21_s27 }
   0x5   :  { %s2763_s28 = scalar_lea.vmem %s34_s25, 256  ;;  %p2768_p1 = scmp.lt.s32.totalorder %s34_s25, %s34_s25 }
   0x6   :  { %p2764_p0 = scmp.ne.s32.totalorder %s34_s25, %s2763_s28  ;;  %p2769_p2 = scmp.lt.s32.totalorder %s2763_s28, %s2763_s28 }
   0x8   :  { %p2770_p3 = por %p2769_p2, %p2768_p1 }
   0xa   :  { %p2771_p4 = pnand %p2770_p3, %p2764_p0 }
   0xc   :  { %2774 = shalt.err (!%p2771_p4)
}
   0xd   :  { %s2865_s29 = smov 128   ;;  %s2866_s30 = smov 8  }
   0xe   :  { %39 = dma.hbm_to_vmem [thread:$0]  %s3662_s1, 256, %s34_s25, [#allocation6], %s2865_s29, %s2865_s29, %s2866_s30  }
   0xf   :  { %s2783_s10 = scalar_lea.vmem %s22_s27, 256  ;;  %p2788_p6 = scmp.lt.s32.totalorder %s22_s27, %s22_s27 }
  0x10   :  { %p2784_p5 = scmp.ne.s32.totalorder %s22_s27, %s2783_s10  ;;  %p2789_p7 = scmp.lt.s32.totalorder %s2783_s10, %s2783_s10 }
  0x12   :  { %p2790_p8 = por %p2789_p7, %p2788_p6 }
  0x14   :  { %p2791_p9 = pnand %p2790_p8, %p2784_p5 }
  0x16   :  { %2794 = shalt.err (!%p2791_p9)
}
  0x17   :  { %27 = dma.hbm_to_vmem [thread:$0]  %s3661_s0, 256, %s22_s27, [#allocation3], %s2865_s29, %s2865_s29, %s2866_s30  }
  0x18   :  { %s2867_s13 = smov [#allocation7]   ;;  %s2868_s15 = smov [#allocation8]  }
  0x19   :  { %s47_s14 = sshll.u32 %s2867_s13, 4  ;;  %s61_s16 = sshll.u32 %s2868_s15, 4  ;;  %s48_s14 = int_to_ptr.vmem [resolvable:$true] %s47_s14  ;;  %s62_s16 = int_to_ptr.vmem [resolvable:$true] %s61_s16 }
  0x1a   :  { %s2803_s1 = scalar_lea.vmem %s48_s14, 2048  ;;  %p2808_p11 = scmp.lt.s32.totalorder %s48_s14, %s48_s14 }
  0x1b   :  { %p2804_p10 = scmp.ne.s32.totalorder %s48_s14, %s2803_s1  ;;  %p2809_p12 = scmp.lt.s32.totalorder %s2803_s1, %s2803_s1 }
  0x1d   :  { %p2810_p13 = por %p2809_p12, %p2808_p11 }
  0x1f   :  { %p2811_p0 = pnand %p2810_p13, %p2804_p10 }
  0x21   :  { %2814 = shalt.err (!%p2811_p0)
}
  0x22   :  { %53 = dma.hbm_to_vmem [thread:$0]  %s3664_s3, 2048, %s48_s14, [#allocation6], %s2865_s29, %s2865_s29, %s2866_s30  }
  0x23   :  { %s2823_s0 = scalar_lea.vmem %s62_s16, 2048  ;;  %p2828_p2 = scmp.lt.s32.totalorder %s62_s16, %s62_s16 }
  0x24   :  { %p2824_p1 = scmp.ne.s32.totalorder %s62_s16, %s2823_s0  ;;  %p2829_p3 = scmp.lt.s32.totalorder %s2823_s0, %s2823_s0 }
  0x26   :  { %p2830_p4 = por %p2829_p3, %p2828_p2 }
  0x28   :  { %p2831_p5 = pnand %p2830_p4, %p2824_p1 }
  0x2a   :  { %2834 = shalt.err (!%p2831_p5)
}
  0x2b   :  { %67 = dma.hbm_to_vmem [thread:$0]  %s3666_s5, 2048, %s62_s16, [#allocation9], %s2865_s29, %s2865_s29, %s2866_s30  }
  0x2c   :  { %2855 = dma.done.wait [#allocation3], 256  }
  0x2d   :  { %2856 = vsyncadd [#allocation3], 4294967040 }
  0x2e   :  { %2857 = dma.done.wait [#allocation6], 2304  }
  0x2f   :  { %2858 = vsyncadd [#allocation6], 4294964992 }
  0x30   :  { %2859 = dma.done.wait [#allocation9], 2048  }
  0x31   :  { %2860 = vsyncadd [#allocation9], 4294965248  ;;  %vm93_vm0 = vcmask 130048   ;;  %v85_v0 = vld [vmem:[#allocation5 + $0x8] sm:$0xff]  ;;  %v84_v1 = vld [vmem:[#allocation5] sm:$0xff] }
  0x32   :  { %v82_v2 = vld [vmem:[#allocation2] sm:$0xff]  ;;  %v2934_v3 = vand.u32 4294901760, %v85_v0  ;;  %v2936_v4 = vand.u32 4294901760, %v84_v1  ;;  %v83_v5 = vld [vmem:[#allocation2 + $0x8] sm:$0xff]  ;;  %v619_v12 = vld [vmem:[#allocation7 + $0x78] sm:$0xff] }
  0x33   :  { %v95_v6 = vsel %vm93_vm0, %v82_v2, 0  ;;  %v98_v7 = vsel %vm93_vm0, %v83_v5, 0  ;;  %v618_v17 = vld [vmem:[#allocation7 + $0x70] sm:$0xff]  ;;  %v2951_v19 = vand.u32 4294901760, %v619_v12  ;;  %v617_v23 = vld [vmem:[#allocation7 + $0x68] sm:$0xff]  ;;  %v616_v29 = vld [vmem:[#allocation7 + $0x60] sm:$0xff] }
  0x34   :  { %v2938_v8 = vand.u32 4294901760, %v95_v6  ;;  %2286 = vmatprep.subr.mxu0 %v2934_v3  ;;  %v217_v9 = vsub.f32 %v85_v0, %v2934_v3  ;;  %v2942_v10 = vand.u32 4294901760, %v98_v7  ;;  %v224_v11 = vsub.f32 %v84_v1, %v2936_v4  ;;  %v615_v34 = vld [vmem:[#allocation7 + $0x58] sm:$0xff]  ;;  %v614_v37 = vld [vmem:[#allocation7 + $0x50] sm:$0xff]  ;;  %v613_v41 = vld [vmem:[#allocation7 + $0x48] sm:$0xff] }
  0x35   :  { %2287 = vmatpush3.msra.mxu0 %v2934_v3  ;;  %v2953_v25 = vand.u32 4294901760, %v618_v17  ;;  %v2956_v31 = vsub.f32 %v619_v12, %v2951_v19  ;;  %v2958_v32 = vand.u32 4294901760, %v617_v23  ;;  %v2963_v36 = vand.u32 4294901760, %v616_v29 }
  0x36   :  { %v168_v13 = vsub.f32 %v95_v6, %v2938_v8  ;;  %2297 = vmatprep.mubr.f32.mxu1 %v2938_v8  ;;  %2288 = vmatprep.subr.mxu0 %v2936_v4  ;;  %v218_v14 = vand.u32 4294901760, %v217_v9  ;;  %v178_v15 = vsub.f32 %v98_v7, %v2942_v10  ;;  %v225_v16 = vand.u32 4294901760, %v224_v11  ;;  %v611_v6 = vld [vmem:[#allocation7 + $0x38] sm:$0xff] }
  0x37   :  { %2289 = vmatpush3.msra.mxu0 %v2936_v4  ;;  %v2961_v35 = vsub.f32 %v618_v17, %v2953_v25  ;;  %v2966_v38 = vand.u32 4294901760, %v2956_v31  ;;  %v2969_v39 = vsub.f32 %v617_v23, %v2958_v32  ;;  %v2971_v40 = vand.u32 4294901760, %v615_v34 }
  0x38   :  { %v169_v18 = vand.u32 4294901760, %v168_v13  ;;  %v219_v20 = vsub.f32 %v217_v9, %v218_v14  ;;  %v179_v21 = vand.u32 4294901760, %v178_v15  ;;  %v226_v22 = vsub.f32 %v224_v11, %v225_v16  ;;  %2300 = vmatprep.subr.mxu0 %v217_v9 }
  0x39   :  { %v2976_v42 = vand.u32 4294901760, %v2961_v35  ;;  %v2979_v43 = vsub.f32 %v616_v29, %v2963_v36  ;;  %v2981_v44 = vand.u32 4294901760, %v614_v37  ;;  %v732_v45 = vsub.f32 %v2956_v31, %v2966_v38 }
  0x3a   :  { %v170_v24 = vsub.f32 %v168_v13, %v169_v18  ;;  %v220_v26 = vand.u32 4294901760, %v219_v20  ;;  %v180_v27 = vsub.f32 %v178_v15, %v179_v21  ;;  %v227_v28 = vand.u32 4294901760, %v226_v22 }
  0x3b   :  { %v2988_v46 = vand.u32 4294901760, %v2969_v39  ;;  %v2991_v47 = vsub.f32 %v615_v34, %v2971_v40  ;;  %v2993_v48 = vand.u32 4294901760, %v613_v41  ;;  %v739_v49 = vsub.f32 %v2961_v35, %v2976_v42  ;;  %v606_v34 = vld [vmem:[#allocation7 + $0x10] sm:$0xff] }
  0x3c   :  { %v171_v30 = vand.u32 4294901760, %v170_v24  ;;  %2293 = vmatprep.subr.mxu1 %v220_v26  ;;  %v181_v33 = vand.u32 4294901760, %v180_v27  ;;  %v2999_v50 = vand.u32 4294901760, %v2979_v43  ;;  %v3002_v51 = vsub.f32 %v614_v37, %v2981_v44 }
  0x3d   :  { %2294 = vmatpush3.msra.mxu1 %v220_v26  ;;  %v733_v52 = vand.u32 4294901760, %v732_v45  ;;  %v746_v53 = vsub.f32 %v2969_v39, %v2988_v46  ;;  %v3008_v54 = vand.u32 4294901760, %v2991_v47  ;;  %v3011_v55 = vsub.f32 %v613_v41, %v2993_v48  ;;  %v607_v26 = vld [vmem:[#allocation7 + $0x18] sm:$0xff] }
  0x3e   :  { %2290 = vmatprep.mubr.f32.mxu0 %v171_v30  ;;  %2295 = vmatprep.subr.mxu1 %v227_v28  ;;  %v740_v56 = vand.u32 4294901760, %v739_v49  ;;  %v753_v57 = vsub.f32 %v2979_v43, %v2999_v50  ;;  %v3020_v58 = vand.u32 4294901760, %v3002_v51  ;;  %v3096_v30 = vand.u32 4294901760, %v607_v26 }
  0x3f   :  { %2291 = vmatmul.mubr.f32.vlgmr.msra.gmra.mxu0 %v181_v33  ;;  %2296 = vmatpush3.msra.mxu1 %v227_v28  ;;  %v747_v59 = vand.u32 4294901760, %v746_v53  ;;  %v760_v60 = vsub.f32 %v2991_v47, %v3008_v54  ;;  %v3028_v61 = vand.u32 4294901760, %v3011_v55  ;;  %v3107_v49 = vand.u32 4294901760, %v606_v34  ;;  %v605_v53 = vld [vmem:[#allocation7 + $0x8] sm:$0xff] }
  0x40   :  { %2301 = vmatpush3.msra.mxu0 %v217_v9  ;;  %2298 = vmatmul.mubr.f32.vlgmr.msra.gmra.mxu1 %v2942_v10  ;;  %v754_v62 = vand.u32 4294901760, %v753_v57  ;;  %v767_v63 = vsub.f32 %v3002_v51, %v3020_v58  ;;  %v610_v9 = vld [vmem:[#allocation7 + $0x30] sm:$0xff]  ;;  %v3105_v45 = vsub.f32 %v607_v26, %v3096_v30 }
  0x41   :  { %2302 = vmatprep.subr.mxu0 %v224_v11  ;;  %2307 = vmatprep.subr.mxu1 %v2934_v3  ;;  %v761_v0 = vand.u32 4294901760, %v760_v60  ;;  %v774_v1 = vsub.f32 %v3011_v55, %v3028_v61  ;;  %v3063_v12 = vand.u32 4294901760, %v610_v9  ;;  %v3120_v60 = vand.u32 4294901760, %v605_v53 }
  0x42   :  { %2303 = vmatpush3.msra.mxu0 %v224_v11  ;;  %2304 = vmatprep.mubr.f32.mxu0 %v168_v13  ;;  %v768_v2 = vand.u32 4294901760, %v767_v63  ;;  %v609_v13 = vld [vmem:[#allocation7 + $0x28] sm:$0xff]  ;;  %v3115_v57 = vand.u32 4294901760, %v3105_v45  ;;  %v604_v63 = vld [vmem:[#allocation7] sm:$0xff] }
  0x43   :  { %2308 = vmatpush3.msra.mxu1 %v2934_v3  ;;  %2305 = vmatmul.mubr.f32.vlgmr.msra.gmra.mxu0 %v178_v15  ;;  %v3075_v17 = vand.u32 4294901760, %v609_v13 }
  0x44   :  { %2309 = vmatprep.subr.mxu1 %v2936_v4  ;;  %2314 = vmatprep.subr.mxu0 %v218_v14  ;;  %3707 = vst [vmem:[#allocation19_spill] sm:$0xff] %v3115_v57 }
  0x45   :  { %2310 = vmatpush3.msra.mxu1 %v2936_v4  ;;  %2311 = vmatprep.mubr.f32.mxu1 %v169_v18  ;;  %v608_v18 = vld [vmem:[#allocation7 + $0x20] sm:$0xff]  ;;  %v3085_v23 = vsub.f32 %v609_v13, %v3075_v17 }
  0x46   :  { %2315 = vmatpush3.msra.mxu0 %v218_v14  ;;  %2312 = vmatmul.mubr.f32.vlgmr.msra.gmra.mxu1 %v179_v21  ;;  %v3088_v24 = vand.u32 4294901760, %v608_v18 }
  0x47   :  { %2316 = vmatprep.subr.mxu0 %v225_v16  ;;  %2321 = vmatprep.subr.mxu1 %v2934_v3  ;;  %v3094_v29 = vand.u32 4294901760, %v3085_v23 }
  0x48   :  { %2317 = vmatpush3.msra.mxu0 %v225_v16  ;;  %2318 = vmatprep.mubr.f32.mxu0 %v2938_v8  ;;  %v3073_v16 = vsub.f32 %v610_v9, %v3063_v12  ;;  %v3099_v33 = vsub.f32 %v608_v18, %v3088_v24 }
  0x49   :  { %2322 = vmatpush3.msra.mxu1 %v2934_v3  ;;  %2319 = vmatmul.mubr.f32.vlgmr.msra.gmra.mxu0 %v2942_v10  ;;  %v775_v3 = vand.u32 4294901760, %v774_v1  ;;  %3705 = vst [vmem:[#allocation17_spill] sm:$0xff] %v3094_v29  ;;  %v802_v41 = vsub.f32 %v3085_v23, %v3094_v29 }
  0x4a   :  { %2323 = vmatprep.subr.mxu1 %v2936_v4  ;;  %2325 = vmatprep.mubr.f32.mxu1 %v2938_v8  ;;  %v3053_v8 = vand.u32 4294901760, %v611_v6  ;;  %v3082_v22 = vand.u32 4294901760, %v3073_v16 }
  0x4b   :  { %2324 = vmatpush3.msra.mxu1 %v2936_v4  ;;  %2328 = vmatprep.subr.mxu0 %v2951_v19  ;;  %v612_v4 = vld [vmem:[#allocation7 + $0x40] sm:$0xff] }
  0x4c   :  { %2326 = vmatmul.mubr.f32.vlgmr.msra.gmra.mxu1 %v2942_v10  ;;  %2363 = vmatprep.subr.mxu1 %v733_v52  ;;  %v3048_v5 = vand.u32 4294901760, %v612_v4  ;;  %v3061_v11 = vsub.f32 %v611_v6, %v3053_v8  ;;  %3704 = vst [vmem:[#allocation16_spill] sm:$0xff] %v3082_v22  ;;  %v795_v28 = vsub.f32 %v3073_v16, %v3082_v22 }
  0x4d   :  { %2364 = vmatpush3.msra.mxu1 %v733_v52  ;;  %2329 = vmatpush3.msra.mxu0 %v2951_v19  ;;  %v3111_v52 = vand.u32 4294901760, %v3099_v33 }
  0x4e   :  { %2365 = vmatprep.subr.mxu1 %v740_v56  ;;  %2330 = vmatprep.subr.mxu0 %v2953_v25  ;;  %v3051_v7 = vsub.f32 %v612_v4, %v3048_v5  ;;  %v3070_v15 = vand.u32 4294901760, %v3061_v11  ;;  %v796_v37 = vand.u32 4294901760, %v795_v28 }
  0x4f   :  { %2366 = vmatpush3.msra.mxu1 %v740_v56  ;;  %2331 = vmatpush3.msra.mxu0 %v2953_v25  ;;  %3706 = vst [vmem:[#allocation18_spill] sm:$0xff] %v3111_v52  ;;  %v803_v56 = vand.u32 4294901760, %v802_v41 }
  0x50   :  { %2367 = vmatprep.subr.mxu1 %v747_v59  ;;  %2332 = vmatprep.subr.mxu0 %v2958_v32  ;;  %v3058_v10 = vand.u32 4294901760, %v3051_v7  ;;  %3703 = vst [vmem:[#allocation15_spill] sm:$0xff] %v3070_v15  ;;  %v788_v21 = vsub.f32 %v3061_v11, %v3070_v15 }
  0x51   :  { %2368 = vmatpush3.msra.mxu1 %v747_v59  ;;  %2333 = vmatpush3.msra.mxu0 %v2958_v32  ;;  %v3118_v59 = vsub.f32 %v606_v34, %v3107_v49  ;;  %v2043_v34 = vld [vmem:[%s3663_s2] ss:$0 sm:$0xff] }
  0x52   :  { %2369 = vmatprep.subr.mxu1 %v754_v62  ;;  %2334 = vmatprep.subr.mxu0 %v2963_v36  ;;  %v781_v14 = vsub.f32 %v3051_v7, %v3058_v10  ;;  %v789_v27 = vand.u32 4294901760, %v788_v21 }
  0x53   :  { %2370 = vmatpush3.msra.mxu1 %v754_v62  ;;  %2335 = vmatpush3.msra.mxu0 %v2963_v36  ;;  %v809_v62 = vsub.f32 %v3099_v33, %v3111_v52  ;;  %v3129_v1 = vand.u32 4294901760, %v3118_v59 }
  0x54   :  { %2371 = vmatprep.subr.mxu1 %v761_v0  ;;  %2336 = vmatprep.subr.mxu0 %v2971_v40  ;;  %v782_v20 = vand.u32 4294901760, %v781_v14 }
  0x55   :  { %2372 = vmatpush3.msra.mxu1 %v761_v0  ;;  %2337 = vmatpush3.msra.mxu0 %v2971_v40  ;;  %v816_v0 = vsub.f32 %v3105_v45, %v3115_v57  ;;  %3708 = vst [vmem:[#allocation20_spill] sm:$0xff] %v3129_v1  ;;  %v810_v4 = vand.u32 4294901760, %v809_v62  ;;  %v823_v9 = vsub.f32 %v3118_v59, %v3129_v1 }
  0x56   :  { %2373 = vmatprep.subr.mxu1 %v768_v2  ;;  %2338 = vmatprep.subr.mxu0 %v2981_v44 }
  0x57   :  { %2374 = vmatpush3.msra.mxu1 %v768_v2  ;;  %2339 = vmatpush3.msra.mxu0 %v2981_v44  ;;  %v3132_v2 = vsub.f32 %v605_v53, %v3120_v60  ;;  %v817_v6 = vand.u32 4294901760, %v816_v0  ;;  %v824_v18 = vand.u32 4294901760, %v823_v9 }
  0x58   :  { %2375 = vmatprep.subr.mxu1 %v775_v3  ;;  %2340 = vmatprep.subr.mxu0 %v2993_v48 }
  0x59   :  { %2376 = vmatpush3.msra.mxu1 %v775_v3  ;;  %2341 = vmatpush3.msra.mxu0 %v2993_v48  ;;  %v3134_v3 = vand.u32 4294901760, %v604_v63  ;;  %v3141_v13 = vand.u32 4294901760, %v3132_v2 }
  0x5a   :  { %2342 = vmatprep.subr.mxu0 %v3048_v5  ;;  %2377 = vmatprep.subr.mxu1 %v782_v20 }
  0x5b   :  { %2343 = vmatpush3.msra.mxu0 %v3048_v5  ;;  %2378 = vmatpush3.msra.mxu1 %v782_v20  ;;  %3709 = vst [vmem:[#allocation21_spill] sm:$0xff] %v3141_v13  ;;  %v3144_v14 = vsub.f32 %v604_v63, %v3134_v3  ;;  %v830_v20 = vsub.f32 %v3132_v2, %v3141_v13 }
  0x5c   :  { %2344 = vmatprep.subr.mxu0 %v3053_v8  ;;  %2379 = vmatprep.subr.mxu1 %v789_v27 }
  0x5d   :  { %2345 = vmatpush3.msra.mxu0 %v3053_v8  ;;  %2380 = vmatpush3.msra.mxu1 %v789_v27  ;;  %v3151_v21 = vand.u32 4294901760, %v3144_v14  ;;  %v831_v26 = vand.u32 4294901760, %v830_v20 }
  0x5e   :  { %2346 = vmatprep.subr.mxu0 %v3063_v12  ;;  %2381 = vmatprep.subr.mxu1 %v796_v37 }
  0x5f   :  { %2347 = vmatpush3.msra.mxu0 %v3063_v12  ;;  %2382 = vmatpush3.msra.mxu1 %v796_v37  ;;  %3710 = vst [vmem:[#allocation22_spill] sm:$0xff] %v3151_v21  ;;  %v837_v27 = vsub.f32 %v3144_v14, %v3151_v21 }
  0x60   :  { %2348 = vmatprep.subr.mxu0 %v3075_v17  ;;  %2383 = vmatprep.subr.mxu1 %v803_v56 }
  0x61   :  { %2349 = vmatpush3.msra.mxu0 %v3075_v17  ;;  %2384 = vmatpush3.msra.mxu1 %v803_v56  ;;  %v838_v28 = vand.u32 4294901760, %v837_v27 }
  0x62   :  { %2350 = vmatprep.subr.mxu0 %v3088_v24  ;;  %2385 = vmatprep.subr.mxu1 %v810_v4 }
  0x63   :  { %2351 = vmatpush3.msra.mxu0 %v3088_v24  ;;  %2386 = vmatpush3.msra.mxu1 %v810_v4 }
  0x64   :  { %2352 = vmatprep.subr.mxu0 %v3096_v30  ;;  %2387 = vmatprep.subr.mxu1 %v817_v6 }
  0x65   :  { %2353 = vmatpush3.msra.mxu0 %v3096_v30  ;;  %2388 = vmatpush3.msra.mxu1 %v817_v6 }
  0x66   :  { %2354 = vmatprep.subr.mxu0 %v3107_v49  ;;  %2389 = vmatprep.subr.mxu1 %v824_v18 }
  0x67   :  { %2355 = vmatpush3.msra.mxu0 %v3107_v49  ;;  %2390 = vmatpush3.msra.mxu1 %v824_v18 }
  0x68   :  { %2356 = vmatprep.subr.mxu0 %v3120_v60  ;;  %2391 = vmatprep.subr.mxu1 %v831_v26 }
  0x69   :  { %2357 = vmatpush3.msra.mxu0 %v3120_v60  ;;  %2392 = vmatpush3.msra.mxu1 %v831_v26 }
  0x6a   :  { %2358 = vmatprep.subr.mxu0 %v3134_v3  ;;  %2393 = vmatprep.subr.mxu1 %v838_v28 }
  0x6b   :  { %2359 = vmatpush3.msra.mxu0 %v3134_v3  ;;  %2394 = vmatpush3.msra.mxu1 %v838_v28 }
  0x6c   :  { %2398 = vmatprep.subr.mxu0 %v2956_v31  ;;  %2433 = vmatprep.subr.mxu1 %v2951_v19 }
  0xff   :  { %v2292_v37 = vpop.f32.mrf.mxu0 }
 0x100   :  { %v184_v41 = vadd.f32 %v2292_v37, %v2043_v34  ;;  %v2299_v56 = vpop.f32.mrf.mxu1 }
 0x101   :  { %v173_v53 = vpop.f32.mrf.mxu0 }
 0x102   :  { %v174_v62 = vadd.f32 %v2043_v34, %v173_v53  ;;  %v271_v63 = vadd.f32 %v2299_v56, %v184_v41  ;;  %v264_v0 = vpop.f32.mrf.mxu1 }
 0x103   :  { %v2306_v6 = vpop.f32.mrf.mxu0 }
 0x104   :  { %v265_v4 = vadd.f32 %v264_v0, %v174_v62  ;;  %v354_v9 = vadd.f32 %v2306_v6, %v271_v63 }
 0x105   :  { %v346_v18 = vpop.f32.mrf.mxu0 }
 0x106   :  { %v347_v20 = vadd.f32 %v346_v18, %v265_v4  ;;  %v2313_v26 = vpop.f32.mrf.mxu1  ;;  %v1321_v18 = vld [vmem:[#allocation8 + $0x40] sm:$0xff] }
 0x107   :  { %v437_v27 = vadd.f32 %v2313_v26, %v354_v9 }
 0x108   :  { %v428_v28 = vpop.f32.mrf.mxu1 }
 0x109   :  { %v429_v21 = vadd.f32 %v428_v28, %v347_v20  ;;  %v2320_v13 = vpop.f32.mrf.mxu0  ;;  %v1320_v28 = vld [vmem:[#allocation8 + $0x38] sm:$0xff] }
 0x10a   :  { %v520_v1 = vadd.f32 %v2320_v13, %v437_v27  ;;  %v3390_v27 = vand.u32 4294901760, %v1321_v18 }
 0x10b   :  { %v513_v57 = vpop.f32.mrf.mxu0 }
 0x10c   :  { %v2327_v52 = vpop.f32.mrf.mxu1  ;;  %v514_v29 = vadd.f32 %v513_v57, %v429_v21 }
 0x10d   :  { %v599_v37 = vadd.f32 %v2327_v52, %v520_v1 }
 0x10e   :  { %v592_v22 = vpop.f32.mrf.mxu1 }
 0x10f   :  { %v603_v15 = vmax.f32 %v599_v37, 0.0  ;;  %v593_v34 = vadd.f32 %v592_v22, %v514_v29 }
 0x111   :  { %v3161_v41 = vand.u32 4294901760, %v603_v15  ;;  %v602_v53 = vmax.f32 %v593_v34, 0.0  ;;  %v3395_v34 = vsub.f32 %v1321_v18, %v3390_v27 }
 0x113   :  { %v3164_v56 = vsub.f32 %v603_v15, %v3161_v41  ;;  %v3166_v62 = vand.u32 4294901760, %v602_v53 }
 0x115   :  { %v720_v63 = vand.u32 4294901760, %v3164_v56  ;;  %v709_v0 = vsub.f32 %v602_v53, %v3166_v62  ;;  %2395 = vmatprep.mubr.f32.mxu1 %v3166_v62  ;;  %v1319_v53 = vld [vmem:[#allocation8 + $0x30] sm:$0xff] }
 0x116   :  { %2396 = vmatmul.mubr.f32.vlgmr.msra.gmra.mxu1 %v3161_v41 }
 0x117   :  { %2434 = vmatpush3.msra.mxu1 %v2951_v19  ;;  %v710_v52 = vand.u32 4294901760, %v709_v0  ;;  %v721_v22 = vsub.f32 %v3164_v56, %v720_v63 }
 0x118   :  { %2435 = vmatprep.subr.mxu1 %v2953_v25 }
 0x119   :  { %2436 = vmatpush3.msra.mxu1 %v2953_v25  ;;  %2465 = vmatprep.mubr.f32.mxu1 %v710_v52  ;;  %v711_v15 = vsub.f32 %v709_v0, %v710_v52  ;;  %v722_v57 = vand.u32 4294901760, %v721_v22  ;;  %v1318_v52 = vld [vmem:[#allocation8 + $0x28] sm:$0xff] }
 0x11a   :  { %2437 = vmatprep.subr.mxu1 %v2958_v32 }
 0x11b   :  { %2438 = vmatpush3.msra.mxu1 %v2958_v32  ;;  %v712_v29 = vand.u32 4294901760, %v711_v15 }
 0x11c   :  { %2439 = vmatprep.subr.mxu1 %v2963_v36 }
 0x11d   :  { %2440 = vmatpush3.msra.mxu1 %v2963_v36  ;;  %2360 = vmatprep.mubr.f32.mxu0 %v712_v29 }
 0x11e   :  { %2441 = vmatprep.subr.mxu1 %v2971_v40  ;;  %2361 = vmatmul.mubr.f32.vlgmr.msra.gmra.mxu0 %v722_v57  ;;  %v3419_v57 = vand.u32 4294901760, %v1318_v52 }
 0x11f   :  { %2399 = vmatpush3.msra.mxu0 %v2956_v31  ;;  %2442 = vmatpush3.msra.mxu1 %v2971_v40  ;;  %v3713_v31 = vld [vmem:[#allocation17_spill] sm:$0xff] }
 0x120   :  { %2400 = vmatprep.subr.mxu0 %v2961_v35  ;;  %2430 = vmatprep.mubr.f32.mxu0 %v709_v0  ;;  %v3407_v0 = vand.u32 4294901760, %v1319_v53 }
 0x121   :  { %2443 = vmatprep.subr.mxu1 %v2981_v44  ;;  %2401 = vmatpush3.msra.mxu0 %v2961_v35  ;;  %v3715_v35 = vld [vmem:[#allocation19_spill] sm:$0xff] }
 0x122   :  { %2444 = vmatpush3.msra.mxu1 %v2981_v44  ;;  %2402 = vmatprep.subr.mxu0 %v2969_v39  ;;  %v3417_v29 = vsub.f32 %v1319_v53, %v3407_v0 }
 0x123   :  { %2445 = vmatprep.subr.mxu1 %v2993_v48  ;;  %2403 = vmatpush3.msra.mxu0 %v2969_v39  ;;  %v3718_v39 = vld [vmem:[#allocation22_spill] sm:$0xff] }
 0x124   :  { %2446 = vmatpush3.msra.mxu1 %v2993_v48  ;;  %2404 = vmatprep.subr.mxu0 %v2979_v43 }
 0x125   :  { %2447 = vmatprep.subr.mxu1 %v3048_v5  ;;  %2405 = vmatpush3.msra.mxu0 %v2979_v43  ;;  %v1327_v43 = vld [vmem:[#allocation8 + $0x70] sm:$0xff] }
 0x126   :  { %2448 = vmatpush3.msra.mxu1 %v3048_v5  ;;  %2406 = vmatprep.subr.mxu0 %v2991_v47 }
 0x127   :  { %2449 = vmatprep.subr.mxu1 %v3053_v8  ;;  %2407 = vmatpush3.msra.mxu0 %v2991_v47  ;;  %v3310_v47 = vand.u32 4294901760, %v1327_v43 }
 0x128   :  { %2450 = vmatpush3.msra.mxu1 %v3053_v8  ;;  %2408 = vmatprep.subr.mxu0 %v3002_v51 }
 0x129   :  { %2451 = vmatprep.subr.mxu1 %v3063_v12  ;;  %2409 = vmatpush3.msra.mxu0 %v3002_v51  ;;  %v1324_v51 = vld [vmem:[#allocation8 + $0x58] sm:$0xff] }
 0x12a   :  { %2452 = vmatpush3.msra.mxu1 %v3063_v12  ;;  %2410 = vmatprep.subr.mxu0 %v3011_v55 }
 0x12b   :  { %2453 = vmatprep.subr.mxu1 %v3075_v17  ;;  %2411 = vmatpush3.msra.mxu0 %v3011_v55  ;;  %v1322_v55 = vld [vmem:[#allocation8 + $0x48] sm:$0xff] }
 0x12c   :  { %2454 = vmatpush3.msra.mxu1 %v3075_v17  ;;  %2412 = vmatprep.subr.mxu0 %v3051_v7 }
 0x12d   :  { %2455 = vmatprep.subr.mxu1 %v3088_v24  ;;  %2413 = vmatpush3.msra.mxu0 %v3051_v7  ;;  %v3324_v7 = vand.u32 4294901760, %v1322_v55 }
 0x12e   :  { %2456 = vmatpush3.msra.mxu1 %v3088_v24  ;;  %2414 = vmatprep.subr.mxu0 %v3061_v11 }
 0x12f   :  { %2457 = vmatprep.subr.mxu1 %v3096_v30  ;;  %2415 = vmatpush3.msra.mxu0 %v3061_v11 }
 0x130   :  { %2458 = vmatpush3.msra.mxu1 %v3096_v30  ;;  %2416 = vmatprep.subr.mxu0 %v3073_v16 }
 0x131   :  { %2459 = vmatprep.subr.mxu1 %v3107_v49  ;;  %2417 = vmatpush3.msra.mxu0 %v3073_v16 }
 0x132   :  { %2460 = vmatpush3.msra.mxu1 %v3107_v49  ;;  %2418 = vmatprep.subr.mxu0 %v3085_v23 }
 0x133   :  { %2461 = vmatprep.subr.mxu1 %v3120_v60  ;;  %2419 = vmatpush3.msra.mxu0 %v3085_v23 }
 0x134   :  { %2462 = vmatpush3.msra.mxu1 %v3120_v60  ;;  %2420 = vmatprep.subr.mxu0 %v3099_v33 }
 0x135   :  { %2463 = vmatprep.subr.mxu1 %v3134_v3  ;;  %2421 = vmatpush3.msra.mxu0 %v3099_v33 }
 0x136   :  { %2464 = vmatpush3.msra.mxu1 %v3134_v3  ;;  %2422 = vmatprep.subr.mxu0 %v3105_v45 }
 0x137   :  { %2466 = vmatmul.mubr.f32.vlgmr.msra.gmra.mxu1 %v720_v63  ;;  %2503 = vmatprep.subr.mxu1 %v2951_v19 }
 0x138   :  { %2423 = vmatpush3.msra.mxu0 %v3105_v45  ;;  %2504 = vmatpush3.msra.mxu1 %v2951_v19  ;;  %v3711_v19 = vld [vmem:[#allocation15_spill] sm:$0xff] }
 0x139   :  { %2535 = vmatprep.mubr.f32.mxu1 %v3166_v62  ;;  %2424 = vmatprep.subr.mxu0 %v3118_v59 }
 0x13a   :  { %2505 = vmatprep.subr.mxu1 %v2953_v25  ;;  %2425 = vmatpush3.msra.mxu0 %v3118_v59 }
 0x13b   :  { %2506 = vmatpush3.msra.mxu1 %v2953_v25  ;;  %2426 = vmatprep.subr.mxu0 %v3132_v2  ;;  %v3712_v25 = vld [vmem:[#allocation16_spill] sm:$0xff] }
 0x13c   :  { %2507 = vmatprep.subr.mxu1 %v2958_v32  ;;  %2427 = vmatpush3.msra.mxu0 %v3132_v2 }
 0x13d   :  { %2508 = vmatpush3.msra.mxu1 %v2958_v32  ;;  %2428 = vmatprep.subr.mxu0 %v3144_v14  ;;  %v3714_v32 = vld [vmem:[#allocation18_spill] sm:$0xff] }
 0x13e   :  { %2509 = vmatprep.subr.mxu1 %v2963_v36  ;;  %2429 = vmatpush3.msra.mxu0 %v3144_v14 }
 0x13f   :  { %2510 = vmatpush3.msra.mxu1 %v2963_v36  ;;  %2431 = vmatmul.mubr.f32.vlgmr.msra.gmra.mxu0 %v3164_v56  ;;  %v3716_v36 = vld [vmem:[#allocation20_spill] sm:$0xff] }
 0x140   :  { %2468 = vmatprep.subr.mxu0 %v2966_v38  ;;  %2511 = vmatprep.subr.mxu1 %v2971_v40 }
 0x141   :  { %2469 = vmatpush3.msra.mxu0 %v2966_v38  ;;  %2500 = vmatprep.mubr.f32.mxu0 %v3166_v62  ;;  %v3717_v38 = vld [vmem:[#allocation21_spill] sm:$0xff]  ;;  %v3402_v62 = vand.u32 4294901760, %v3395_v34 }
 0x142   :  { %2512 = vmatpush3.msra.mxu1 %v2971_v40  ;;  %2470 = vmatprep.subr.mxu0 %v2976_v42  ;;  %v1328_v40 = vld [vmem:[#allocation8 + $0x78] sm:$0xff] }
 0x143   :  { %2513 = vmatprep.subr.mxu1 %v2981_v44  ;;  %2471 = vmatpush3.msra.mxu0 %v2976_v42  ;;  %v3308_v42 = vand.u32 4294901760, %v1328_v40  ;;  %3719 = vst [vmem:[#allocation15_spill] sm:$0xff] %v3402_v62  ;;  %v1490_v22 = vsub.f32 %v3395_v34, %v3402_v62 }
 0x144   :  { %2514 = vmatpush3.msra.mxu1 %v2981_v44  ;;  %2472 = vmatprep.subr.mxu0 %v2988_v46  ;;  %v1326_v44 = vld [vmem:[#allocation8 + $0x68] sm:$0xff] }
 0x145   :  { %2515 = vmatprep.subr.mxu1 %v2993_v48  ;;  %2473 = vmatpush3.msra.mxu0 %v2988_v46  ;;  %v1325_v46 = vld [vmem:[#allocation8 + $0x60] sm:$0xff] }
 0x146   :  { %2516 = vmatpush3.msra.mxu1 %v2993_v48  ;;  %2474 = vmatprep.subr.mxu0 %v2999_v50  ;;  %v3312_v48 = vand.u32 4294901760, %v1326_v44 }
 0x147   :  { %2517 = vmatprep.subr.mxu1 %v3048_v5  ;;  %2475 = vmatpush3.msra.mxu0 %v2999_v50  ;;  %v3314_v50 = vand.u32 4294901760, %v1325_v46 }
 0x148   :  { %2518 = vmatpush3.msra.mxu1 %v3048_v5  ;;  %2476 = vmatprep.subr.mxu0 %v3008_v54 }
 0x149   :  { %2519 = vmatprep.subr.mxu1 %v3053_v8  ;;  %2477 = vmatpush3.msra.mxu0 %v3008_v54  ;;  %v1323_v54 = vld [vmem:[#allocation8 + $0x50] sm:$0xff]  ;;  %v3333_v11 = vsub.f32 %v1325_v46, %v3314_v50 }
 0x14a   :  { %2520 = vmatpush3.msra.mxu1 %v3053_v8  ;;  %2478 = vmatprep.subr.mxu0 %v3020_v58  ;;  %v3322_v5 = vand.u32 4294901760, %v1323_v54  ;;  %v3327_v8 = vsub.f32 %v1327_v43, %v3310_v47 }
 0x14b   :  { %2521 = vmatprep.subr.mxu1 %v3063_v12  ;;  %2479 = vmatpush3.msra.mxu0 %v3020_v58  ;;  %v3317_v58 = vsub.f32 %v1328_v40, %v3308_v42 }
 0x14c   :  { %2522 = vmatpush3.msra.mxu1 %v3063_v12  ;;  %2480 = vmatprep.subr.mxu0 %v3028_v61  ;;  %v3347_v23 = vand.u32 4294901760, %v3327_v8 }
 0x14d   :  { %2523 = vmatprep.subr.mxu1 %v3075_v17  ;;  %2481 = vmatpush3.msra.mxu0 %v3028_v61  ;;  %v3320_v61 = vand.u32 4294901760, %v1324_v51  ;;  %v3337_v12 = vand.u32 4294901760, %v3317_v58 }
 0x14e   :  { %2524 = vmatpush3.msra.mxu1 %v3075_v17  ;;  %2482 = vmatprep.subr.mxu0 %v3058_v10  ;;  %v3344_v17 = vsub.f32 %v1323_v54, %v3322_v5  ;;  %v1448_v59 = vsub.f32 %v3327_v8, %v3347_v23 }
 0x14f   :  { %2525 = vmatprep.subr.mxu1 %v3088_v24  ;;  %2483 = vmatpush3.msra.mxu0 %v3058_v10  ;;  %v3330_v10 = vsub.f32 %v1326_v44, %v3312_v48  ;;  %v3340_v16 = vsub.f32 %v1324_v51, %v3320_v61  ;;  %v1441_v33 = vsub.f32 %v3317_v58, %v3337_v12  ;;  %v1315_v51 = vld [vmem:[#allocation8 + $0x10] sm:$0xff] }
 0x150   :  { %2526 = vmatpush3.msra.mxu1 %v3088_v24  ;;  %2484 = vmatprep.subr.mxu0 %v3711_v19  ;;  %v1449_v13 = vand.u32 4294901760, %v1448_v59  ;;  %v3451_v59 = vand.u32 4294901760, %v1315_v51 }
 0x151   :  { %2527 = vmatprep.subr.mxu1 %v3096_v30  ;;  %2485 = vmatpush3.msra.mxu0 %v3711_v19  ;;  %v3350_v24 = vand.u32 4294901760, %v3330_v10  ;;  %v3359_v45 = vand.u32 4294901760, %v3340_v16  ;;  %v1442_v1 = vand.u32 4294901760, %v1441_v33  ;;  %v1317_v19 = vld [vmem:[#allocation8 + $0x20] sm:$0xff] }
 0x152   :  { %2528 = vmatpush3.msra.mxu1 %v3096_v30  ;;  %2486 = vmatprep.subr.mxu0 %v3712_v25  ;;  %v3353_v30 = vand.u32 4294901760, %v3333_v11 }
 0x153   :  { %2529 = vmatprep.subr.mxu1 %v3107_v49  ;;  %2487 = vmatpush3.msra.mxu0 %v3712_v25  ;;  %v1469_v21 = vsub.f32 %v3340_v16, %v3359_v45  ;;  %v1491_v25 = vand.u32 4294901760, %v1490_v22 }
 0x154   :  { %2530 = vmatpush3.msra.mxu1 %v3107_v49  ;;  %2488 = vmatprep.subr.mxu0 %v3713_v31  ;;  %v3363_v49 = vsub.f32 %v1322_v55, %v3324_v7  ;;  %v1462_v2 = vsub.f32 %v3333_v11, %v3353_v30 }
 0x155   :  { %2531 = vmatprep.subr.mxu1 %v3120_v60  ;;  %2489 = vmatpush3.msra.mxu0 %v3713_v31  ;;  %v1470_v20 = vand.u32 4294901760, %v1469_v21 }
 0x156   :  { %2532 = vmatpush3.msra.mxu1 %v3120_v60  ;;  %2490 = vmatprep.subr.mxu0 %v3714_v32  ;;  %v1455_v60 = vsub.f32 %v3330_v10, %v3350_v24  ;;  %v3380_v4 = vand.u32 4294901760, %v3363_v49  ;;  %v1463_v6 = vand.u32 4294901760, %v1462_v2 }
 0x157   :  { %2533 = vmatprep.subr.mxu1 %v3134_v3  ;;  %2491 = vmatpush3.msra.mxu0 %v3714_v32  ;;  %v3426_v32 = vand.u32 4294901760, %v3417_v29 }
 0x158   :  { %2534 = vmatpush3.msra.mxu1 %v3134_v3  ;;  %2492 = vmatprep.subr.mxu0 %v3715_v35  ;;  %v3373_v3 = vand.u32 4294901760, %v3344_v17  ;;  %v1456_v14 = vand.u32 4294901760, %v1455_v60  ;;  %v1483_v26 = vsub.f32 %v3363_v49, %v3380_v4 }
 0x159   :  { %2536 = vmatmul.mubr.f32.vlgmr.msra.gmra.mxu1 %v3161_v41  ;;  %2493 = vmatpush3.msra.mxu0 %v3715_v35  ;;  %3721 = vst [vmem:[#allocation17_spill] sm:$0xff] %v3426_v32  ;;  %v3429_v35 = vsub.f32 %v1318_v52, %v3419_v57  ;;  %v1504_v40 = vsub.f32 %v3417_v29, %v3426_v32 }
 0x15a   :  { %2494 = vmatprep.subr.mxu0 %v3716_v36  ;;  %2573 = vmatprep.subr.mxu1 %v1442_v1  ;;  %v1476_v9 = vsub.f32 %v3344_v17, %v3373_v3  ;;  %v1484_v56 = vand.u32 4294901760, %v1483_v26 }
 0x15b   :  { %2495 = vmatpush3.msra.mxu0 %v3716_v36  ;;  %2574 = vmatpush3.msra.mxu1 %v1442_v1  ;;  %v3432_v36 = vand.u32 4294901760, %v1317_v19  ;;  %v3438_v43 = vand.u32 4294901760, %v3429_v35  ;;  %v1505_v54 = vand.u32 4294901760, %v1504_v40  ;;  %v1314_v1 = vld [vmem:[#allocation8 + $0x8] sm:$0xff] }
 0x15c   :  { %2496 = vmatprep.subr.mxu0 %v3717_v38  ;;  %2575 = vmatprep.subr.mxu1 %v1449_v13  ;;  %v1477_v37 = vand.u32 4294901760, %v1476_v9  ;;  %v3464_v21 = vand.u32 4294901760, %v1314_v1  ;;  %v1313_v9 = vld [vmem:[#allocation8] sm:$0xff] }
 0x15d   :  { %2497 = vmatpush3.msra.mxu0 %v3717_v38  ;;  %2576 = vmatpush3.msra.mxu1 %v1449_v13  ;;  %v1316_v38 = vld [vmem:[#allocation8 + $0x18] sm:$0xff]  ;;  %3722 = vst [vmem:[#allocation18_spill] sm:$0xff] %v3438_v43  ;;  %v3443_v46 = vsub.f32 %v1317_v19, %v3432_v36  ;;  %v1511_v55 = vsub.f32 %v3429_v35, %v3438_v43 }
 0x15e   :  { %2498 = vmatprep.subr.mxu0 %v3718_v39  ;;  %2577 = vmatprep.subr.mxu1 %v1456_v14  ;;  %v3440_v44 = vand.u32 4294901760, %v1316_v38  ;;  %v3476_v26 = vsub.f32 %v1314_v1, %v3464_v21 }
 0x15f   :  { %2499 = vmatpush3.msra.mxu0 %v3718_v39  ;;  %2578 = vmatpush3.msra.mxu1 %v1456_v14  ;;  %v3455_v60 = vand.u32 4294901760, %v3443_v46  ;;  %v1512_v2 = vand.u32 4294901760, %v1511_v55  ;;  %v3462_v14 = vsub.f32 %v1315_v51, %v3451_v59 }
 0x160   :  { %2501 = vmatmul.mubr.f32.vlgmr.msra.gmra.mxu0 %v3161_v41  ;;  %2538 = vmatprep.subr.mxu0 %v3308_v42  ;;  %v3397_v41 = vand.u32 4294901760, %v1320_v28  ;;  %v3449_v33 = vsub.f32 %v1316_v38, %v3440_v44  ;;  %v3485_v52 = vand.u32 4294901760, %v3476_v26 }
 0x161   :  { %2539 = vmatpush3.msra.mxu0 %v3308_v42  ;;  %2579 = vmatprep.subr.mxu1 %v1463_v6  ;;  %3723 = vst [vmem:[#allocation19_spill] sm:$0xff] %v3455_v60 }
 0x162   :  { %2540 = vmatprep.subr.mxu0 %v3310_v47  ;;  %2580 = vmatpush3.msra.mxu1 %v1463_v6  ;;  %v3405_v63 = vsub.f32 %v1320_v28, %v3397_v41  ;;  %v3459_v13 = vand.u32 4294901760, %v3449_v33  ;;  %v1518_v6 = vsub.f32 %v3443_v46, %v3455_v60  ;;  %v3478_v28 = vand.u32 4294901760, %v1313_v9  ;;  %3726 = vst [vmem:[#allocation22_spill] sm:$0xff] %v3485_v52 }
 0x163   :  { %2541 = vmatpush3.msra.mxu0 %v3310_v47  ;;  %2581 = vmatprep.subr.mxu1 %v1470_v20 }
 0x164   :  { %2542 = vmatprep.subr.mxu0 %v3312_v48  ;;  %2582 = vmatpush3.msra.mxu1 %v1470_v20  ;;  %v3414_v15 = vand.u32 4294901760, %v3405_v63  ;;  %3724 = vst [vmem:[#allocation20_spill] sm:$0xff] %v3459_v13  ;;  %v1525_v18 = vsub.f32 %v3449_v33, %v3459_v13  ;;  %v3473_v20 = vand.u32 4294901760, %v3462_v14  ;;  %v3488_v22 = vsub.f32 %v1313_v9, %v3478_v28 }
 0x165   :  { %2543 = vmatpush3.msra.mxu0 %v3312_v48  ;;  %2583 = vmatprep.subr.mxu1 %v1477_v37 }
 0x166   :  { %2544 = vmatprep.subr.mxu0 %v3314_v50  ;;  %3720 = vst [vmem:[#allocation16_spill] sm:$0xff] %v3414_v15  ;;  %2584 = vmatpush3.msra.mxu1 %v1477_v37  ;;  %v1497_v31 = vsub.f32 %v3405_v63, %v3414_v15  ;;  %3725 = vst [vmem:[#allocation21_spill] sm:$0xff] %v3473_v20  ;;  %v1519_v37 = vand.u32 4294901760, %v1518_v6  ;;  %v1526_v53 = vand.u32 4294901760, %v1525_v18 }
 0x167   :  { %2545 = vmatpush3.msra.mxu0 %v3314_v50  ;;  %2585 = vmatprep.subr.mxu1 %v1484_v56 }
 0x168   :  { %2546 = vmatprep.subr.mxu0 %v3320_v61  ;;  %2586 = vmatpush3.msra.mxu1 %v1484_v56  ;;  %v1498_v39 = vand.u32 4294901760, %v1497_v31  ;;  %v1532_v56 = vsub.f32 %v3462_v14, %v3473_v20  ;;  %v3495_v31 = vand.u32 4294901760, %v3488_v22 }
 0x169   :  { %2547 = vmatpush3.msra.mxu0 %v3320_v61  ;;  %2587 = vmatprep.subr.mxu1 %v1491_v25 }
 0x16a   :  { %2548 = vmatprep.subr.mxu0 %v3322_v5  ;;  %2588 = vmatpush3.msra.mxu1 %v1491_v25  ;;  %v1533_v19 = vand.u32 4294901760, %v1532_v56  ;;  %v1539_v25 = vsub.f32 %v3476_v26, %v3485_v52  ;;  %3727 = vst [vmem:[#allocation23_spill] sm:$0xff] %v3495_v31 }
 0x16b   :  { %2549 = vmatpush3.msra.mxu0 %v3322_v5  ;;  %2589 = vmatprep.subr.mxu1 %v1498_v39 }
 0x16c   :  { %2550 = vmatprep.subr.mxu0 %v3324_v7  ;;  %2590 = vmatpush3.msra.mxu1 %v1498_v39  ;;  %v1540_v38 = vand.u32 4294901760, %v1539_v25  ;;  %v1546_v39 = vsub.f32 %v3488_v22, %v3495_v31 }
 0x16d   :  { %2551 = vmatpush3.msra.mxu0 %v3324_v7  ;;  %2591 = vmatprep.subr.mxu1 %v1505_v54 }
 0x16e   :  { %2552 = vmatprep.subr.mxu0 %v3390_v27  ;;  %2592 = vmatpush3.msra.mxu1 %v1505_v54  ;;  %v1547_v40 = vand.u32 4294901760, %v1546_v39  ;;  %v2044_v54 = vld [vmem:[%s3665_s4] ss:$0 sm:$0xff] }
 0x16f   :  { %2553 = vmatpush3.msra.mxu0 %v3390_v27  ;;  %2593 = vmatprep.subr.mxu1 %v1512_v2 }
 0x170   :  { %2554 = vmatprep.subr.mxu0 %v3397_v41  ;;  %2594 = vmatpush3.msra.mxu1 %v1512_v2 }
 0x171   :  { %2555 = vmatpush3.msra.mxu0 %v3397_v41  ;;  %2595 = vmatprep.subr.mxu1 %v1519_v37 }
 0x172   :  { %2556 = vmatprep.subr.mxu0 %v3407_v0  ;;  %2596 = vmatpush3.msra.mxu1 %v1519_v37 }
 0x173   :  { %2557 = vmatpush3.msra.mxu0 %v3407_v0  ;;  %2597 = vmatprep.subr.mxu1 %v1526_v53 }
 0x174   :  { %2558 = vmatprep.subr.mxu0 %v3419_v57  ;;  %2598 = vmatpush3.msra.mxu1 %v1526_v53 }
 0x175   :  { %2559 = vmatpush3.msra.mxu0 %v3419_v57  ;;  %2599 = vmatprep.subr.mxu1 %v1533_v19 }
 0x176   :  { %2560 = vmatprep.subr.mxu0 %v3432_v36  ;;  %2600 = vmatpush3.msra.mxu1 %v1533_v19 }
 0x177   :  { %2561 = vmatpush3.msra.mxu0 %v3432_v36  ;;  %2601 = vmatprep.subr.mxu1 %v1540_v38 }
 0x178   :  { %2562 = vmatprep.subr.mxu0 %v3440_v44  ;;  %2602 = vmatpush3.msra.mxu1 %v1540_v38 }
 0x179   :  { %2563 = vmatpush3.msra.mxu0 %v3440_v44  ;;  %2603 = vmatprep.subr.mxu1 %v1547_v40 }
 0x17a   :  { %2564 = vmatprep.subr.mxu0 %v3451_v59  ;;  %2604 = vmatpush3.msra.mxu1 %v1547_v40 }
 0x17b   :  { %2565 = vmatpush3.msra.mxu0 %v3451_v59  ;;  %2643 = vmatprep.subr.mxu1 %v3308_v42 }
 0x17c   :  { %2566 = vmatprep.subr.mxu0 %v3464_v21 }
 0x17d   :  { %2567 = vmatpush3.msra.mxu0 %v3464_v21 }
 0x17e   :  { %2568 = vmatprep.subr.mxu0 %v3478_v28 }
 0x17f   :  { %2569 = vmatpush3.msra.mxu0 %v3478_v28 }
 0x180   :  { %2608 = vmatprep.subr.mxu0 %v3317_v58 }
 0x1d6   :  { %v2397_v55 = vpop.f32.mrf.mxu1 }
 0x1d8   :  { %v875_v18 = vpop.f32.mrf.mxu1 }
 0x1de   :  { %v2362_v51 = vpop.f32.mrf.mxu0 }
 0x1df   :  { %v725_v2 = vadd.f32 %v2362_v51, %v2044_v54 }
 0x1e0   :  { %v714_v1 = vpop.f32.mrf.mxu0 }
 0x1e1   :  { %v715_v9 = vadd.f32 %v2044_v54, %v714_v1  ;;  %v882_v37 = vadd.f32 %v2397_v55, %v725_v2 }
 0x1e3   :  { %v876_v25 = vadd.f32 %v875_v18, %v715_v9 }
 0x1f7   :  { %v2467_v53 = vpop.f32.mrf.mxu1 }
 0x1f9   :  { %v1081_v39 = vpop.f32.mrf.mxu1 }
 0x1ff   :  { %v2432_v6 = vpop.f32.mrf.mxu0 }
 0x200   :  { %v993_v19 = vadd.f32 %v2432_v6, %v882_v37 }
 0x201   :  { %v985_v56 = vpop.f32.mrf.mxu0 }
 0x202   :  { %v986_v38 = vadd.f32 %v985_v56, %v876_v25  ;;  %v1090_v40 = vadd.f32 %v2467_v53, %v993_v19 }
 0x204   :  { %v1082_v13 = vadd.f32 %v1081_v39, %v986_v38 }
 0x219   :  { %v2537_v31 = vpop.f32.mrf.mxu1 }
 0x21b   :  { %v1301_v15 = vpop.f32.mrf.mxu1 }
 0x220   :  { %v2502_v52 = vpop.f32.mrf.mxu0 }
 0x221   :  { %v1215_v20 = vadd.f32 %v2502_v52, %v1090_v40 }
 0x222   :  { %v1208_v60 = vpop.f32.mrf.mxu0 }
 0x223   :  { %v1308_v43 = vadd.f32 %v2537_v31, %v1215_v20  ;;  %v1209_v32 = vadd.f32 %v1208_v60, %v1082_v13 }
 0x225   :  { %v1312_v51 = vmax.f32 %v1308_v43, 0.0  ;;  %v1302_v62 = vadd.f32 %v1301_v15, %v1209_v32 }
 0x227   :  { %v3505_v54 = vand.u32 4294901760, %v1312_v51  ;;  %v1311_v55 = vmax.f32 %v1302_v62, 0.0 }
 0x229   :  { %v3508_v1 = vsub.f32 %v1312_v51, %v3505_v54  ;;  %v3510_v2 = vand.u32 4294901760, %v1311_v55 }
 0x22b   :  { %v1429_v6 = vand.u32 4294901760, %v3508_v1  ;;  %v1418_v9 = vsub.f32 %v1311_v55, %v3510_v2  ;;  %2605 = vmatprep.mubr.f32.mxu1 %v3510_v2 }
 0x22c   :  { %2606 = vmatmul.mubr.f32.vlgmr.msra.gmra.mxu1 %v3505_v54 }
 0x22d   :  { %2644 = vmatpush3.msra.mxu1 %v3308_v42  ;;  %v1419_v43 = vand.u32 4294901760, %v1418_v9  ;;  %v1430_v62 = vsub.f32 %v3508_v1, %v1429_v6 }
 0x22e   :  { %2645 = vmatprep.subr.mxu1 %v3310_v47 }
 0x22f   :  { %2646 = vmatpush3.msra.mxu1 %v3310_v47  ;;  %2675 = vmatprep.mubr.f32.mxu1 %v1419_v43  ;;  %v1420_v15 = vsub.f32 %v1418_v9, %v1419_v43  ;;  %v1431_v60 = vand.u32 4294901760, %v1430_v62 }
 0x230   :  { %2647 = vmatprep.subr.mxu1 %v3312_v48 }
 0x231   :  { %2648 = vmatpush3.msra.mxu1 %v3312_v48  ;;  %v1421_v32 = vand.u32 4294901760, %v1420_v15 }
 0x232   :  { %2649 = vmatprep.subr.mxu1 %v3314_v50 }
 0x233   :  { %2650 = vmatpush3.msra.mxu1 %v3314_v50  ;;  %2570 = vmatprep.mubr.f32.mxu0 %v1421_v32 }
 0x234   :  { %2651 = vmatprep.subr.mxu1 %v3320_v61  ;;  %2571 = vmatmul.mubr.f32.vlgmr.msra.gmra.mxu0 %v1431_v60 }
 0x235   :  { %2609 = vmatpush3.msra.mxu0 %v3317_v58  ;;  %2652 = vmatpush3.msra.mxu1 %v3320_v61  ;;  %v3732_v58 = vld [vmem:[#allocation19_spill] sm:$0xff] }
 0x236   :  { %2610 = vmatprep.subr.mxu0 %v3327_v8  ;;  %2640 = vmatprep.mubr.f32.mxu0 %v1418_v9 }
 0x237   :  { %2653 = vmatprep.subr.mxu1 %v3322_v5  ;;  %2611 = vmatpush3.msra.mxu0 %v3327_v8  ;;  %v3736_v8 = vld [vmem:[#allocation23_spill] sm:$0xff] }
 0x238   :  { %2654 = vmatpush3.msra.mxu1 %v3322_v5  ;;  %2612 = vmatprep.subr.mxu0 %v3330_v10 }
 0x239   :  { %2655 = vmatprep.subr.mxu1 %v3324_v7  ;;  %2613 = vmatpush3.msra.mxu0 %v3330_v10 }
 0x23a   :  { %2656 = vmatpush3.msra.mxu1 %v3324_v7  ;;  %2614 = vmatprep.subr.mxu0 %v3333_v11 }
 0x23b   :  { %2657 = vmatprep.subr.mxu1 %v3390_v27  ;;  %2615 = vmatpush3.msra.mxu0 %v3333_v11  ;;  %v2045_v11 = vld [vmem:[%s3667_s6] ss:$0 sm:$0xff]  ;;  %s2869_s6 = smov [#allocation10]  }
 0x23c   :  { %2658 = vmatpush3.msra.mxu1 %v3390_v27  ;;  %2616 = vmatprep.subr.mxu0 %v3340_v16  ;;  %s2029_s23 = sshll.u32 %s2869_s6, 4  ;;  %s2030_s23 = int_to_ptr.vmem [resolvable:$true] %s2029_s23 }
 0x23d   :  { %2659 = vmatprep.subr.mxu1 %v3397_v41  ;;  %2617 = vmatpush3.msra.mxu0 %v3340_v16  ;;  %s2835_s24 = scalar_lea.vmem %s2030_s23, 256  ;;  %p2840_p7 = scmp.lt.s32.totalorder %s2030_s23, %s2030_s23 }
 0x23e   :  { %2660 = vmatpush3.msra.mxu1 %v3397_v41  ;;  %2618 = vmatprep.subr.mxu0 %v3344_v17  ;;  %p2836_p6 = scmp.ne.s32.totalorder %s2030_s23, %s2835_s24  ;;  %p2841_p8 = scmp.lt.s32.totalorder %s2835_s24, %s2835_s24 }
 0x23f   :  { %2661 = vmatprep.subr.mxu1 %v3407_v0  ;;  %2619 = vmatpush3.msra.mxu0 %v3344_v17 }
 0x240   :  { %2662 = vmatpush3.msra.mxu1 %v3407_v0  ;;  %2620 = vmatprep.subr.mxu0 %v3363_v49  ;;  %p2842_p9 = por %p2841_p8, %p2840_p7 }
 0x241   :  { %2663 = vmatprep.subr.mxu1 %v3419_v57  ;;  %2621 = vmatpush3.msra.mxu0 %v3363_v49 }
 0x242   :  { %2664 = vmatpush3.msra.mxu1 %v3419_v57  ;;  %2622 = vmatprep.subr.mxu0 %v3395_v34  ;;  %p2843_p10 = pnand %p2842_p9, %p2836_p6 }
 0x243   :  { %2665 = vmatprep.subr.mxu1 %v3432_v36  ;;  %2623 = vmatpush3.msra.mxu0 %v3395_v34 }
 0x244   :  { %2666 = vmatpush3.msra.mxu1 %v3432_v36  ;;  %2624 = vmatprep.subr.mxu0 %v3405_v63 }
 0x245   :  { %2667 = vmatprep.subr.mxu1 %v3440_v44  ;;  %2625 = vmatpush3.msra.mxu0 %v3405_v63 }
 0x246   :  { %2668 = vmatpush3.msra.mxu1 %v3440_v44  ;;  %2626 = vmatprep.subr.mxu0 %v3417_v29 }
 0x247   :  { %2669 = vmatprep.subr.mxu1 %v3451_v59  ;;  %2627 = vmatpush3.msra.mxu0 %v3417_v29 }
 0x248   :  { %2670 = vmatpush3.msra.mxu1 %v3451_v59  ;;  %2628 = vmatprep.subr.mxu0 %v3429_v35 }
 0x249   :  { %2671 = vmatprep.subr.mxu1 %v3464_v21  ;;  %2629 = vmatpush3.msra.mxu0 %v3429_v35 }
 0x24a   :  { %2672 = vmatpush3.msra.mxu1 %v3464_v21  ;;  %2630 = vmatprep.subr.mxu0 %v3443_v46 }
 0x24b   :  { %2673 = vmatprep.subr.mxu1 %v3478_v28  ;;  %2631 = vmatpush3.msra.mxu0 %v3443_v46 }
 0x24c   :  { %2674 = vmatpush3.msra.mxu1 %v3478_v28  ;;  %2632 = vmatprep.subr.mxu0 %v3449_v33 }
 0x24d   :  { %2676 = vmatmul.mubr.f32.vlgmr.msra.gmra.mxu1 %v1429_v6  ;;  %2713 = vmatprep.subr.mxu1 %v3308_v42 }
 0x24e   :  { %2633 = vmatpush3.msra.mxu0 %v3449_v33  ;;  %2714 = vmatpush3.msra.mxu1 %v3308_v42  ;;  %v3728_v42 = vld [vmem:[#allocation15_spill] sm:$0xff] }
 0x24f   :  { %2745 = vmatprep.mubr.f32.mxu1 %v3510_v2  ;;  %2634 = vmatprep.subr.mxu0 %v3462_v14 }
 0x250   :  { %2715 = vmatprep.subr.mxu1 %v3310_v47  ;;  %2635 = vmatpush3.msra.mxu0 %v3462_v14 }
 0x251   :  { %2716 = vmatpush3.msra.mxu1 %v3310_v47  ;;  %2636 = vmatprep.subr.mxu0 %v3476_v26  ;;  %v3729_v47 = vld [vmem:[#allocation16_spill] sm:$0xff] }
 0x252   :  { %2717 = vmatprep.subr.mxu1 %v3312_v48  ;;  %2637 = vmatpush3.msra.mxu0 %v3476_v26 }
 0x253   :  { %2718 = vmatpush3.msra.mxu1 %v3312_v48  ;;  %2638 = vmatprep.subr.mxu0 %v3488_v22  ;;  %v3730_v48 = vld [vmem:[#allocation17_spill] sm:$0xff] }
 0x254   :  { %2719 = vmatprep.subr.mxu1 %v3314_v50  ;;  %2639 = vmatpush3.msra.mxu0 %v3488_v22 }
 0x255   :  { %2720 = vmatpush3.msra.mxu1 %v3314_v50  ;;  %2641 = vmatmul.mubr.f32.vlgmr.msra.gmra.mxu0 %v3508_v1  ;;  %v3731_v50 = vld [vmem:[#allocation18_spill] sm:$0xff] }
 0x256   :  { %2678 = vmatprep.subr.mxu0 %v3337_v12  ;;  %2721 = vmatprep.subr.mxu1 %v3320_v61 }
 0x257   :  { %2679 = vmatpush3.msra.mxu0 %v3337_v12  ;;  %2710 = vmatprep.mubr.f32.mxu0 %v3510_v2 }
 0x258   :  { %2722 = vmatpush3.msra.mxu1 %v3320_v61  ;;  %2680 = vmatprep.subr.mxu0 %v3347_v23  ;;  %v3733_v61 = vld [vmem:[#allocation20_spill] sm:$0xff] }
 0x259   :  { %2723 = vmatprep.subr.mxu1 %v3322_v5  ;;  %2681 = vmatpush3.msra.mxu0 %v3347_v23 }
 0x25a   :  { %2724 = vmatpush3.msra.mxu1 %v3322_v5  ;;  %2682 = vmatprep.subr.mxu0 %v3350_v24  ;;  %v3734_v5 = vld [vmem:[#allocation21_spill] sm:$0xff] }
 0x25b   :  { %2725 = vmatprep.subr.mxu1 %v3324_v7  ;;  %2683 = vmatpush3.msra.mxu0 %v3350_v24 }
 0x25c   :  { %2726 = vmatpush3.msra.mxu1 %v3324_v7  ;;  %2684 = vmatprep.subr.mxu0 %v3353_v30  ;;  %v3735_v7 = vld [vmem:[#allocation22_spill] sm:$0xff] }
 0x25d   :  { %2727 = vmatprep.subr.mxu1 %v3390_v27  ;;  %2685 = vmatpush3.msra.mxu0 %v3353_v30 }
 0x25e   :  { %2728 = vmatpush3.msra.mxu1 %v3390_v27  ;;  %2686 = vmatprep.subr.mxu0 %v3359_v45 }
 0x25f   :  { %2729 = vmatprep.subr.mxu1 %v3397_v41  ;;  %2687 = vmatpush3.msra.mxu0 %v3359_v45 }
 0x260   :  { %2730 = vmatpush3.msra.mxu1 %v3397_v41  ;;  %2688 = vmatprep.subr.mxu0 %v3373_v3 }
 0x261   :  { %2731 = vmatprep.subr.mxu1 %v3407_v0  ;;  %2689 = vmatpush3.msra.mxu0 %v3373_v3 }
 0x262   :  { %2732 = vmatpush3.msra.mxu1 %v3407_v0  ;;  %2690 = vmatprep.subr.mxu0 %v3380_v4 }
 0x263   :  { %2733 = vmatprep.subr.mxu1 %v3419_v57  ;;  %2691 = vmatpush3.msra.mxu0 %v3380_v4 }
 0x264   :  { %2734 = vmatpush3.msra.mxu1 %v3419_v57  ;;  %2692 = vmatprep.subr.mxu0 %v3728_v42 }
 0x265   :  { %2735 = vmatprep.subr.mxu1 %v3432_v36  ;;  %2693 = vmatpush3.msra.mxu0 %v3728_v42 }
 0x266   :  { %2736 = vmatpush3.msra.mxu1 %v3432_v36  ;;  %2694 = vmatprep.subr.mxu0 %v3729_v47 }
 0x267   :  { %2737 = vmatprep.subr.mxu1 %v3440_v44  ;;  %2695 = vmatpush3.msra.mxu0 %v3729_v47 }
 0x268   :  { %2738 = vmatpush3.msra.mxu1 %v3440_v44  ;;  %2696 = vmatprep.subr.mxu0 %v3730_v48 }
 0x269   :  { %2739 = vmatprep.subr.mxu1 %v3451_v59  ;;  %2697 = vmatpush3.msra.mxu0 %v3730_v48 }
 0x26a   :  { %2740 = vmatpush3.msra.mxu1 %v3451_v59  ;;  %2698 = vmatprep.subr.mxu0 %v3731_v50 }
 0x26b   :  { %2741 = vmatprep.subr.mxu1 %v3464_v21  ;;  %2699 = vmatpush3.msra.mxu0 %v3731_v50 }
 0x26c   :  { %2742 = vmatpush3.msra.mxu1 %v3464_v21  ;;  %2700 = vmatprep.subr.mxu0 %v3732_v58 }
 0x26d   :  { %2743 = vmatprep.subr.mxu1 %v3478_v28  ;;  %2701 = vmatpush3.msra.mxu0 %v3732_v58 }
 0x26e   :  { %2744 = vmatpush3.msra.mxu1 %v3478_v28  ;;  %2702 = vmatprep.subr.mxu0 %v3733_v61 }
 0x26f   :  { %2746 = vmatmul.mubr.f32.vlgmr.msra.gmra.mxu1 %v3505_v54  ;;  %2703 = vmatpush3.msra.mxu0 %v3733_v61 }
 0x270   :  { %2704 = vmatprep.subr.mxu0 %v3734_v5 }
 0x271   :  { %2705 = vmatpush3.msra.mxu0 %v3734_v5 }
 0x272   :  { %2706 = vmatprep.subr.mxu0 %v3735_v7 }
 0x273   :  { %2707 = vmatpush3.msra.mxu0 %v3735_v7 }
 0x274   :  { %2708 = vmatprep.subr.mxu0 %v3736_v8 }
 0x275   :  { %2709 = vmatpush3.msra.mxu0 %v3736_v8 }
 0x276   :  { %2711 = vmatmul.mubr.f32.vlgmr.msra.gmra.mxu0 %v3505_v54 }
 0x2ec   :  { %v2607_v12 = vpop.f32.mrf.mxu1 }
 0x2ee   :  { %v1584_v30 = vpop.f32.mrf.mxu1 }
 0x2f4   :  { %v2572_v10 = vpop.f32.mrf.mxu0 }
 0x2f5   :  { %v1434_v17 = vadd.f32 %v2572_v10, %v2045_v11 }
 0x2f6   :  { %v1423_v16 = vpop.f32.mrf.mxu0 }
 0x2f7   :  { %v1424_v24 = vadd.f32 %v2045_v11, %v1423_v16  ;;  %v1591_v45 = vadd.f32 %v2607_v12, %v1434_v17 }
 0x2f9   :  { %v1585_v27 = vadd.f32 %v1584_v30, %v1424_v24 }
 0x30d   :  { %v2677_v49 = vpop.f32.mrf.mxu1 }
 0x30f   :  { %v1790_v41 = vpop.f32.mrf.mxu1 }
 0x315   :  { %v2642_v23 = vpop.f32.mrf.mxu0 }
 0x316   :  { %v1702_v4 = vadd.f32 %v2642_v23, %v1591_v45 }
 0x317   :  { %v1694_v3 = vpop.f32.mrf.mxu0 }
 0x318   :  { %v1695_v34 = vadd.f32 %v1694_v3, %v1585_v27  ;;  %v1799_v63 = vadd.f32 %v2677_v49, %v1702_v4 }
 0x31a   :  { %v1791_v35 = vadd.f32 %v1790_v41, %v1695_v34 }
 0x32f   :  { %v2747_v0 = vpop.f32.mrf.mxu1 }
 0x331   :  { %v2010_v33 = vpop.f32.mrf.mxu1 }
 0x336   :  { %v2712_v29 = vpop.f32.mrf.mxu0 }
 0x337   :  { %v1924_v57 = vadd.f32 %v2712_v29, %v1799_v63 }
 0x338   :  { %v1917_v36 = vpop.f32.mrf.mxu0 }
 0x339   :  { %v2017_v44 = vadd.f32 %v2747_v0, %v1924_v57  ;;  %v1918_v46 = vadd.f32 %v1917_v36, %v1791_v35 }
 0x33b   :  { %v2021_v59 = vmax.f32 %v2017_v44, 0.0  ;;  %v2011_v13 = vadd.f32 %v2010_v33, %v1918_v46 }
 0x33d   :  { %2023 = vst [vmem:[#allocation10 + $0x8] sm:$0xff] %v2021_v59  ;;  %v2020_v14 = vmax.f32 %v2011_v13, 0.0 }
 0x33f   :  { %2022 = vst [vmem:[#allocation10] sm:$0xff] %v2020_v14 }
 0x340   :  { %2846 = shalt.err (!%p2843_p10)
}
 0x341   :  { %2035 = dma.vmem_to_hbm [thread:$0]  %s2030_s23, 256, %s3668_s7, [#allocation4], %s2865_s29, %s2865_s29, %s2866_s30  }
 0x342   :  { %2861 = dma.done.wait [#allocation4], 256  }
 0x343   :  { %2862 = vsyncadd [#allocation4], 4294967040 }
 0x344   :  { %2039 = vsyncpa [#allocation3], 1 }
 0x345   :  { %2040 = vsyncpa [#allocation6], 1 }
 0x346   :  { %2041 = vsyncpa [#allocation9], 1 }
 0x347   :  { %2042 = vsyncpa [#allocation4], 1 }

// kernel: tpu_custom_call.1
= control target key start
LH: loop header
LB: loop body
LE: loop exit
PB: predicated region body
PF: predicated region fallthrough
CT: control target
= control target key end

     0   :  { %12 = vsyncpa [#allocation3], 0  ;;  %s3661_s0 = inlined_call_operand.hbm [shape: f32[16,16], index: 0, kind: input, shape index: {}]   ;;  %s3662_s1 = inlined_call_operand.hbm [shape: f32[16,128], index: 1, kind: input, shape index: {}]   ;;  %s3663_s2 = inlined_call_operand.vmem [shape: f32[1,128], index: 2, kind: input, shape index: {}]   ;;  %s3664_s3 = inlined_call_operand.hbm [shape: f32[128,128], index: 3, kind: input, shape index: {}]   ;;  %s3665_s4 = inlined_call_operand.vmem [shape: f32[1,128], index: 4, kind: input, shape index: {}]   ;;  %s3666_s5 = inlined_call_operand.hbm [shape: f32[128,128], index: 5, kind: input, shape index: {}]   ;;  %s3667_s6 = inlined_call_operand.vmem [shape: f32[1,128], index: 6, kind: input, shape index: {}]   ;;  %s3668_s7 = inlined_call_operand.hbm [shape: f32[16,128], index: 7, kind: output, shape index: {}]  }
   0x1   :  { %13 = vsyncpa [#allocation6], 0 }
   0x2   :  { %14 = vsyncpa [#allocation9], 0 }
   0x3   :  { %15 = vsyncpa [#allocation4], 0  ;;  %s2863_s24 = smov [#allocation5]   ;;  %s2864_s26 = smov [#allocation2]  }
   0x4   :  { %s33_s25 = sshll.u32 %s2863_s24, 4  ;;  %s21_s27 = sshll.u32 %s2864_s26, 4  ;;  %s34_s25 = int_to_ptr.vmem [resolvable:$true] %s33_s25  ;;  %s22_s27 = int_to_ptr.vmem [resolvable:$true] %s21_s27 }
   0x5   :  { %s2763_s28 = scalar_lea.vmem %s34_s25, 256  ;;  %p2768_p1 = scmp.lt.s32.totalorder %s34_s25, %s34_s25 }
   0x6   :  { %p2764_p0 = scmp.ne.s32.totalorder %s34_s25, %s2763_s28  ;;  %p2769_p2 = scmp.lt.s32.totalorder %s2763_s28, %s2763_s28 }
   0x8   :  { %p2770_p3 = por %p2769_p2, %p2768_p1 }
   0xa   :  { %p2771_p4 = pnand %p2770_p3, %p2764_p0 }
   0xc   :  { %2774 = shalt.err (!%p2771_p4)
}
   0xd   :  { %s2865_s29 = smov 128   ;;  %s2866_s30 = smov 8  }
   0xe   :  { %39 = dma.hbm_to_vmem [thread:$0]  %s3662_s1, 256, %s34_s25, [#allocation6], %s2865_s29, %s2865_s29, %s2866_s30  }
   0xf   :  { %s2783_s10 = scalar_lea.vmem %s22_s27, 256  ;;  %p2788_p6 = scmp.lt.s32.totalorder %s22_s27, %s22_s27 }
  0x10   :  { %p2784_p5 = scmp.ne.s32.totalorder %s22_s27, %s2783_s10  ;;  %p2789_p7 = scmp.lt.s32.totalorder %s2783_s10, %s2783_s10 }
  0x12   :  { %p2790_p8 = por %p2789_p7, %p2788_p6 }
  0x14   :  { %p2791_p9 = pnand %p2790_p8, %p2784_p5 }
  0x16   :  { %2794 = shalt.err (!%p2791_p9)
}
  0x17   :  { %27 = dma.hbm_to_vmem [thread:$0]  %s3661_s0, 256, %s22_s27, [#allocation3], %s2865_s29, %s2865_s29, %s2866_s30  }
  0x18   :  { %s2867_s13 = smov [#allocation7]   ;;  %s2868_s15 = smov [#allocation8]  }
  0x19   :  { %s47_s14 = sshll.u32 %s2867_s13, 4  ;;  %s61_s16 = sshll.u32 %s2868_s15, 4  ;;  %s48_s14 = int_to_ptr.vmem [resolvable:$true] %s47_s14  ;;  %s62_s16 = int_to_ptr.vmem [resolvable:$true] %s61_s16 }
  0x1a   :  { %s2803_s1 = scalar_lea.vmem %s48_s14, 2048  ;;  %p2808_p11 = scmp.lt.s32.totalorder %s48_s14, %s48_s14 }
  0x1b   :  { %p2804_p10 = scmp.ne.s32.totalorder %s48_s14, %s2803_s1  ;;  %p2809_p12 = scmp.lt.s32.totalorder %s2803_s1, %s2803_s1 }
  0x1d   :  { %p2810_p13 = por %p2809_p12, %p2808_p11 }
  0x1f   :  { %p2811_p0 = pnand %p2810_p13, %p2804_p10 }
  0x21   :  { %2814 = shalt.err (!%p2811_p0)
}
  0x22   :  { %53 = dma.hbm_to_vmem [thread:$0]  %s3664_s3, 2048, %s48_s14, [#allocation6], %s2865_s29, %s2865_s29, %s2866_s30  }
  0x23   :  { %s2823_s0 = scalar_lea.vmem %s62_s16, 2048  ;;  %p2828_p2 = scmp.lt.s32.totalorder %s62_s16, %s62_s16 }
  0x24   :  { %p2824_p1 = scmp.ne.s32.totalorder %s62_s16, %s2823_s0  ;;  %p2829_p3 = scmp.lt.s32.totalorder %s2823_s0, %s2823_s0 }
  0x26   :  { %p2830_p4 = por %p2829_p3, %p2828_p2 }
  0x28   :  { %p2831_p5 = pnand %p2830_p4, %p2824_p1 }
  0x2a   :  { %2834 = shalt.err (!%p2831_p5)
}
  0x2b   :  { %67 = dma.hbm_to_vmem [thread:$0]  %s3666_s5, 2048, %s62_s16, [#allocation9], %s2865_s29, %s2865_s29, %s2866_s30  }
  0x2c   :  { %2855 = dma.done.wait [#allocation3], 256  }
  0x2d   :  { %2856 = vsyncadd [#allocation3], 4294967040 }
  0x2e   :  { %2857 = dma.done.wait [#allocation6], 2304  }
  0x2f   :  { %2858 = vsyncadd [#allocation6], 4294964992 }
  0x30   :  { %2859 = dma.done.wait [#allocation9], 2048  }
  0x31   :  { %2860 = vsyncadd [#allocation9], 4294965248  ;;  %vm93_vm0 = vcmask 130048   ;;  %v85_v0 = vld [vmem:[#allocation5 + $0x8] sm:$0xff]  ;;  %v84_v1 = vld [vmem:[#allocation5] sm:$0xff] }
  0x32   :  { %v82_v2 = vld [vmem:[#allocation2] sm:$0xff]  ;;  %v2934_v3 = vand.u32 4294901760, %v85_v0  ;;  %v2936_v4 = vand.u32 4294901760, %v84_v1  ;;  %v83_v5 = vld [vmem:[#allocation2 + $0x8] sm:$0xff]  ;;  %v619_v12 = vld [vmem:[#allocation7 + $0x78] sm:$0xff] }
  0x33   :  { %v95_v6 = vsel %vm93_vm0, %v82_v2, 0  ;;  %v98_v7 = vsel %vm93_vm0, %v83_v5, 0  ;;  %v618_v17 = vld [vmem:[#allocation7 + $0x70] sm:$0xff]  ;;  %v2951_v19 = vand.u32 4294901760, %v619_v12  ;;  %v617_v23 = vld [vmem:[#allocation7 + $0x68] sm:$0xff]  ;;  %v616_v29 = vld [vmem:[#allocation7 + $0x60] sm:$0xff] }
  0x34   :  { %v2938_v8 = vand.u32 4294901760, %v95_v6  ;;  %2286 = vmatprep.subr.mxu0 %v2934_v3  ;;  %v217_v9 = vsub.f32 %v85_v0, %v2934_v3  ;;  %v2942_v10 = vand.u32 4294901760, %v98_v7  ;;  %v224_v11 = vsub.f32 %v84_v1, %v2936_v4  ;;  %v615_v34 = vld [vmem:[#allocation7 + $0x58] sm:$0xff]  ;;  %v614_v37 = vld [vmem:[#allocation7 + $0x50] sm:$0xff]  ;;  %v613_v41 = vld [vmem:[#allocation7 + $0x48] sm:$0xff] }
  0x35   :  { %2287 = vmatpush3.msra.mxu0 %v2934_v3  ;;  %v2953_v25 = vand.u32 4294901760, %v618_v17  ;;  %v2956_v31 = vsub.f32 %v619_v12, %v2951_v19  ;;  %v2958_v32 = vand.u32 4294901760, %v617_v23  ;;  %v2963_v36 = vand.u32 4294901760, %v616_v29 }
  0x36   :  { %v168_v13 = vsub.f32 %v95_v6, %v2938_v8  ;;  %2297 = vmatprep.mubr.f32.mxu1 %v2938_v8  ;;  %2288 = vmatprep.subr.mxu0 %v2936_v4  ;;  %v218_v14 = vand.u32 4294901760, %v217_v9  ;;  %v178_v15 = vsub.f32 %v98_v7, %v2942_v10  ;;  %v225_v16 = vand.u32 4294901760, %v224_v11  ;;  %v611_v6 = vld [vmem:[#allocation7 + $0x38] sm:$0xff] }
  0x37   :  { %2289 = vmatpush3.msra.mxu0 %v2936_v4  ;;  %v2961_v35 = vsub.f32 %v618_v17, %v2953_v25  ;;  %v2966_v38 = vand.u32 4294901760, %v2956_v31  ;;  %v2969_v39 = vsub.f32 %v617_v23, %v2958_v32  ;;  %v2971_v40 = vand.u32 4294901760, %v615_v34 }
  0x38   :  { %v169_v18 = vand.u32 4294901760, %v168_v13  ;;  %v219_v20 = vsub.f32 %v217_v9, %v218_v14  ;;  %v179_v21 = vand.u32 4294901760, %v178_v15  ;;  %v226_v22 = vsub.f32 %v224_v11, %v225_v16  ;;  %2300 = vmatprep.subr.mxu0 %v217_v9 }
  0x39   :  { %v2976_v42 = vand.u32 4294901760, %v2961_v35  ;;  %v2979_v43 = vsub.f32 %v616_v29, %v2963_v36  ;;  %v2981_v44 = vand.u32 4294901760, %v614_v37  ;;  %v732_v45 = vsub.f32 %v2956_v31, %v2966_v38 }
  0x3a   :  { %v170_v24 = vsub.f32 %v168_v13, %v169_v18  ;;  %v220_v26 = vand.u32 4294901760, %v219_v20  ;;  %v180_v27 = vsub.f32 %v178_v15, %v179_v21  ;;  %v227_v28 = vand.u32 4294901760, %v226_v22 }
  0x3b   :  { %v2988_v46 = vand.u32 4294901760, %v2969_v39  ;;  %v2991_v47 = vsub.f32 %v615_v34, %v2971_v40  ;;  %v2993_v48 = vand.u32 4294901760, %v613_v41  ;;  %v739_v49 = vsub.f32 %v2961_v35, %v2976_v42  ;;  %v606_v34 = vld [vmem:[#allocation7 + $0x10] sm:$0xff] }
  0x3c   :  { %v171_v30 = vand.u32 4294901760, %v170_v24  ;;  %2293 = vmatprep.subr.mxu1 %v220_v26  ;;  %v181_v33 = vand.u32 4294901760, %v180_v27  ;;  %v2999_v50 = vand.u32 4294901760, %v2979_v43  ;;  %v3002_v51 = vsub.f32 %v614_v37, %v2981_v44 }
  0x3d   :  { %2294 = vmatpush3.msra.mxu1 %v220_v26  ;;  %v733_v52 = vand.u32 4294901760, %v732_v45  ;;  %v746_v53 = vsub.f32 %v2969_v39, %v2988_v46  ;;  %v3008_v54 = vand.u32 4294901760, %v2991_v47  ;;  %v3011_v55 = vsub.f32 %v613_v41, %v2993_v48  ;;  %v607_v26 = vld [vmem:[#allocation7 + $0x18] sm:$0xff] }
  0x3e   :  { %2290 = vmatprep.mubr.f32.mxu0 %v171_v30  ;;  %2295 = vmatprep.subr.mxu1 %v227_v28  ;;  %v740_v56 = vand.u32 4294901760, %v739_v49  ;;  %v753_v57 = vsub.f32 %v2979_v43, %v2999_v50  ;;  %v3020_v58 = vand.u32 4294901760, %v3002_v51  ;;  %v3096_v30 = vand.u32 4294901760, %v607_v26 }
  0x3f   :  { %2291 = vmatmul.mubr.f32.vlgmr.msra.gmra.mxu0 %v181_v33  ;;  %2296 = vmatpush3.msra.mxu1 %v227_v28  ;;  %v747_v59 = vand.u32 4294901760, %v746_v53  ;;  %v760_v60 = vsub.f32 %v2991_v47, %v3008_v54  ;;  %v3028_v61 = vand.u32 4294901760, %v3011_v55  ;;  %v3107_v49 = vand.u32 4294901760, %v606_v34  ;;  %v605_v53 = vld [vmem:[#allocation7 + $0x8] sm:$0xff] }
  0x40   :  { %2301 = vmatpush3.msra.mxu0 %v217_v9  ;;  %2298 = vmatmul.mubr.f32.vlgmr.msra.gmra.mxu1 %v2942_v10  ;;  %v754_v62 = vand.u32 4294901760, %v753_v57  ;;  %v767_v63 = vsub.f32 %v3002_v51, %v3020_v58  ;;  %v610_v9 = vld [vmem:[#allocation7 + $0x30] sm:$0xff]  ;;  %v3105_v45 = vsub.f32 %v607_v26, %v3096_v30 }
  0x41   :  { %2302 = vmatprep.subr.mxu0 %v224_v11  ;;  %2307 = vmatprep.subr.mxu1 %v2934_v3  ;;  %v761_v0 = vand.u32 4294901760, %v760_v60  ;;  %v774_v1 = vsub.f32 %v3011_v55, %v3028_v61  ;;  %v3063_v12 = vand.u32 4294901760, %v610_v9  ;;  %v3120_v60 = vand.u32 4294901760, %v605_v53 }
  0x42   :  { %2303 = vmatpush3.msra.mxu0 %v224_v11  ;;  %2304 = vmatprep.mubr.f32.mxu0 %v168_v13  ;;  %v768_v2 = vand.u32 4294901760, %v767_v63  ;;  %v609_v13 = vld [vmem:[#allocation7 + $0x28] sm:$0xff]  ;;  %v3115_v57 = vand.u32 4294901760, %v3105_v45  ;;  %v604_v63 = vld [vmem:[#allocation7] sm:$0xff] }
  0x43   :  { %2308 = vmatpush3.msra.mxu1 %v2934_v3  ;;  %2305 = vmatmul.mubr.f32.vlgmr.msra.gmra.mxu0 %v178_v15  ;;  %v3075_v17 = vand.u32 4294901760, %v609_v13 }
  0x44   :  { %2309 = vmatprep.subr.mxu1 %v2936_v4  ;;  %2314 = vmatprep.subr.mxu0 %v218_v14  ;;  %3707 = vst [vmem:[#allocation19_spill] sm:$0xff] %v3115_v57 }
  0x45   :  { %2310 = vmatpush3.msra.mxu1 %v2936_v4  ;;  %2311 = vmatprep.mubr.f32.mxu1 %v169_v18  ;;  %v608_v18 = vld [vmem:[#allocation7 + $0x20] sm:$0xff]  ;;  %v3085_v23 = vsub.f32 %v609_v13, %v3075_v17 }
  0x46   :  { %2315 = vmatpush3.msra.mxu0 %v218_v14  ;;  %2312 = vmatmul.mubr.f32.vlgmr.msra.gmra.mxu1 %v179_v21  ;;  %v3088_v24 = vand.u32 4294901760, %v608_v18 }
  0x47   :  { %2316 = vmatprep.subr.mxu0 %v225_v16  ;;  %2321 = vmatprep.subr.mxu1 %v2934_v3  ;;  %v3094_v29 = vand.u32 4294901760, %v3085_v23 }
  0x48   :  { %2317 = vmatpush3.msra.mxu0 %v225_v16  ;;  %2318 = vmatprep.mubr.f32.mxu0 %v2938_v8  ;;  %v3073_v16 = vsub.f32 %v610_v9, %v3063_v12  ;;  %v3099_v33 = vsub.f32 %v608_v18, %v3088_v24 }
  0x49   :  { %2322 = vmatpush3.msra.mxu1 %v2934_v3  ;;  %2319 = vmatmul.mubr.f32.vlgmr.msra.gmra.mxu0 %v2942_v10  ;;  %v775_v3 = vand.u32 4294901760, %v774_v1  ;;  %3705 = vst [vmem:[#allocation17_spill] sm:$0xff] %v3094_v29  ;;  %v802_v41 = vsub.f32 %v3085_v23, %v3094_v29 }
  0x4a   :  { %2323 = vmatprep.subr.mxu1 %v2936_v4  ;;  %2325 = vmatprep.mubr.f32.mxu1 %v2938_v8  ;;  %v3053_v8 = vand.u32 4294901760, %v611_v6  ;;  %v3082_v22 = vand.u32 4294901760, %v3073_v16 }
  0x4b   :  { %2324 = vmatpush3.msra.mxu1 %v2936_v4  ;;  %2328 = vmatprep.subr.mxu0 %v2951_v19  ;;  %v612_v4 = vld [vmem:[#allocation7 + $0x40] sm:$0xff] }
  0x4c   :  { %2326 = vmatmul.mubr.f32.vlgmr.msra.gmra.mxu1 %v2942_v10  ;;  %2363 = vmatprep.subr.mxu1 %v733_v52  ;;  %v3048_v5 = vand.u32 4294901760, %v612_v4  ;;  %v3061_v11 = vsub.f32 %v611_v6, %v3053_v8  ;;  %3704 = vst [vmem:[#allocation16_spill] sm:$0xff] %v3082_v22  ;;  %v795_v28 = vsub.f32 %v3073_v16, %v3082_v22 }
  0x4d   :  { %2364 = vmatpush3.msra.mxu1 %v733_v52  ;;  %2329 = vmatpush3.msra.mxu0 %v2951_v19  ;;  %v3111_v52 = vand.u32 4294901760, %v3099_v33 }
  0x4e   :  { %2365 = vmatprep.subr.mxu1 %v740_v56  ;;  %2330 = vmatprep.subr.mxu0 %v2953_v25  ;;  %v3051_v7 = vsub.f32 %v612_v4, %v3048_v5  ;;  %v3070_v15 = vand.u32 4294901760, %v3061_v11  ;;  %v796_v37 = vand.u32 4294901760, %v795_v28 }
  0x4f   :  { %2366 = vmatpush3.msra.mxu1 %v740_v56  ;;  %2331 = vmatpush3.msra.mxu0 %v2953_v25  ;;  %3706 = vst [vmem:[#allocation18_spill] sm:$0xff] %v3111_v52  ;;  %v803_v56 = vand.u32 4294901760, %v802_v41 }
  0x50   :  { %2367 = vmatprep.subr.mxu1 %v747_v59  ;;  %2332 = vmatprep.subr.mxu0 %v2958_v32  ;;  %v3058_v10 = vand.u32 4294901760, %v3051_v7  ;;  %3703 = vst [vmem:[#allocation15_spill] sm:$0xff] %v3070_v15  ;;  %v788_v21 = vsub.f32 %v3061_v11, %v3070_v15 }
  0x51   :  { %2368 = vmatpush3.msra.mxu1 %v747_v59  ;;  %2333 = vmatpush3.msra.mxu0 %v2958_v32  ;;  %v3118_v59 = vsub.f32 %v606_v34, %v3107_v49  ;;  %v2043_v34 = vld [vmem:[%s3663_s2] ss:$0 sm:$0xff] }
  0x52   :  { %2369 = vmatprep.subr.mxu1 %v754_v62  ;;  %2334 = vmatprep.subr.mxu0 %v2963_v36  ;;  %v781_v14 = vsub.f32 %v3051_v7, %v3058_v10  ;;  %v789_v27 = vand.u32 4294901760, %v788_v21 }
  0x53   :  { %2370 = vmatpush3.msra.mxu1 %v754_v62  ;;  %2335 = vmatpush3.msra.mxu0 %v2963_v36  ;;  %v809_v62 = vsub.f32 %v3099_v33, %v3111_v52  ;;  %v3129_v1 = vand.u32 4294901760, %v3118_v59 }
  0x54   :  { %2371 = vmatprep.subr.mxu1 %v761_v0  ;;  %2336 = vmatprep.subr.mxu0 %v2971_v40  ;;  %v782_v20 = vand.u32 4294901760, %v781_v14 }
  0x55   :  { %2372 = vmatpush3.msra.mxu1 %v761_v0  ;;  %2337 = vmatpush3.msra.mxu0 %v2971_v40  ;;  %v816_v0 = vsub.f32 %v3105_v45, %v3115_v57  ;;  %3708 = vst [vmem:[#allocation20_spill] sm:$0xff] %v3129_v1  ;;  %v810_v4 = vand.u32 4294901760, %v809_v62  ;;  %v823_v9 = vsub.f32 %v3118_v59, %v3129_v1 }
  0x56   :  { %2373 = vmatprep.subr.mxu1 %v768_v2  ;;  %2338 = vmatprep.subr.mxu0 %v2981_v44 }
  0x57   :  { %2374 = vmatpush3.msra.mxu1 %v768_v2  ;;  %2339 = vmatpush3.msra.mxu0 %v2981_v44  ;;  %v3132_v2 = vsub.f32 %v605_v53, %v3120_v60  ;;  %v817_v6 = vand.u32 4294901760, %v816_v0  ;;  %v824_v18 = vand.u32 4294901760, %v823_v9 }
  0x58   :  { %2375 = vmatprep.subr.mxu1 %v775_v3  ;;  %2340 = vmatprep.subr.mxu0 %v2993_v48 }
  0x59   :  { %2376 = vmatpush3.msra.mxu1 %v775_v3  ;;  %2341 = vmatpush3.msra.mxu0 %v2993_v48  ;;  %v3134_v3 = vand.u32 4294901760, %v604_v63  ;;  %v3141_v13 = vand.u32 4294901760, %v3132_v2 }
  0x5a   :  { %2342 = vmatprep.subr.mxu0 %v3048_v5  ;;  %2377 = vmatprep.subr.mxu1 %v782_v20 }
  0x5b   :  { %2343 = vmatpush3.msra.mxu0 %v3048_v5  ;;  %2378 = vmatpush3.msra.mxu1 %v782_v20  ;;  %3709 = vst [vmem:[#allocation21_spill] sm:$0xff] %v3141_v13  ;;  %v3144_v14 = vsub.f32 %v604_v63, %v3134_v3  ;;  %v830_v20 = vsub.f32 %v3132_v2, %v3141_v13 }
  0x5c   :  { %2344 = vmatprep.subr.mxu0 %v3053_v8  ;;  %2379 = vmatprep.subr.mxu1 %v789_v27 }
  0x5d   :  { %2345 = vmatpush3.msra.mxu0 %v3053_v8  ;;  %2380 = vmatpush3.msra.mxu1 %v789_v27  ;;  %v3151_v21 = vand.u32 4294901760, %v3144_v14  ;;  %v831_v26 = vand.u32 4294901760, %v830_v20 }
  0x5e   :  { %2346 = vmatprep.subr.mxu0 %v3063_v12  ;;  %2381 = vmatprep.subr.mxu1 %v796_v37 }
  0x5f   :  { %2347 = vmatpush3.msra.mxu0 %v3063_v12  ;;  %2382 = vmatpush3.msra.mxu1 %v796_v37  ;;  %3710 = vst [vmem:[#allocation22_spill] sm:$0xff] %v3151_v21  ;;  %v837_v27 = vsub.f32 %v3144_v14, %v3151_v21 }
  0x60   :  { %2348 = vmatprep.subr.mxu0 %v3075_v17  ;;  %2383 = vmatprep.subr.mxu1 %v803_v56 }
  0x61   :  { %2349 = vmatpush3.msra.mxu0 %v3075_v17  ;;  %2384 = vmatpush3.msra.mxu1 %v803_v56  ;;  %v838_v28 = vand.u32 4294901760, %v837_v27 }
  0x62   :  { %2350 = vmatprep.subr.mxu0 %v3088_v24  ;;  %2385 = vmatprep.subr.mxu1 %v810_v4 }
  0x63   :  { %2351 = vmatpush3.msra.mxu0 %v3088_v24  ;;  %2386 = vmatpush3.msra.mxu1 %v810_v4 }
  0x64   :  { %2352 = vmatprep.subr.mxu0 %v3096_v30  ;;  %2387 = vmatprep.subr.mxu1 %v817_v6 }
  0x65   :  { %2353 = vmatpush3.msra.mxu0 %v3096_v30  ;;  %2388 = vmatpush3.msra.mxu1 %v817_v6 }
  0x66   :  { %2354 = vmatprep.subr.mxu0 %v3107_v49  ;;  %2389 = vmatprep.subr.mxu1 %v824_v18 }
  0x67   :  { %2355 = vmatpush3.msra.mxu0 %v3107_v49  ;;  %2390 = vmatpush3.msra.mxu1 %v824_v18 }
  0x68   :  { %2356 = vmatprep.subr.mxu0 %v3120_v60  ;;  %2391 = vmatprep.subr.mxu1 %v831_v26 }
  0x69   :  { %2357 = vmatpush3.msra.mxu0 %v3120_v60  ;;  %2392 = vmatpush3.msra.mxu1 %v831_v26 }
  0x6a   :  { %2358 = vmatprep.subr.mxu0 %v3134_v3  ;;  %2393 = vmatprep.subr.mxu1 %v838_v28 }
  0x6b   :  { %2359 = vmatpush3.msra.mxu0 %v3134_v3  ;;  %2394 = vmatpush3.msra.mxu1 %v838_v28 }
  0x6c   :  { %2398 = vmatprep.subr.mxu0 %v2956_v31  ;;  %2433 = vmatprep.subr.mxu1 %v2951_v19 }
  0xff   :  { %v2292_v37 = vpop.f32.mrf.mxu0 }
 0x100   :  { %v184_v41 = vadd.f32 %v2292_v37, %v2043_v34  ;;  %v2299_v56 = vpop.f32.mrf.mxu1 }
 0x101   :  { %v173_v53 = vpop.f32.mrf.mxu0 }
 0x102   :  { %v174_v62 = vadd.f32 %v2043_v34, %v173_v53  ;;  %v271_v63 = vadd.f32 %v2299_v56, %v184_v41  ;;  %v264_v0 = vpop.f32.mrf.mxu1 }
 0x103   :  { %v2306_v6 = vpop.f32.mrf.mxu0 }
 0x104   :  { %v265_v4 = vadd.f32 %v264_v0, %v174_v62  ;;  %v354_v9 = vadd.f32 %v2306_v6, %v271_v63 }
 0x105   :  { %v346_v18 = vpop.f32.mrf.mxu0 }
 0x106   :  { %v347_v20 = vadd.f32 %v346_v18, %v265_v4  ;;  %v2313_v26 = vpop.f32.mrf.mxu1  ;;  %v1321_v18 = vld [vmem:[#allocation8 + $0x40] sm:$0xff] }
 0x107   :  { %v437_v27 = vadd.f32 %v2313_v26, %v354_v9 }
 0x108   :  { %v428_v28 = vpop.f32.mrf.mxu1 }
 0x109   :  { %v429_v21 = vadd.f32 %v428_v28, %v347_v20  ;;  %v2320_v13 = vpop.f32.mrf.mxu0  ;;  %v1320_v28 = vld [vmem:[#allocation8 + $0x38] sm:$0xff] }
 0x10a   :  { %v520_v1 = vadd.f32 %v2320_v13, %v437_v27  ;;  %v3390_v27 = vand.u32 4294901760, %v1321_v18 }
 0x10b   :  { %v513_v57 = vpop.f32.mrf.mxu0 }
 0x10c   :  { %v2327_v52 = vpop.f32.mrf.mxu1  ;;  %v514_v29 = vadd.f32 %v513_v57, %v429_v21 }
 0x10d   :  { %v599_v37 = vadd.f32 %v2327_v52, %v520_v1 }
 0x10e   :  { %v592_v22 = vpop.f32.mrf.mxu1 }
 0x10f   :  { %v603_v15 = vmax.f32 %v599_v37, 0.0  ;;  %v593_v34 = vadd.f32 %v592_v22, %v514_v29 }
 0x111   :  { %v3161_v41 = vand.u32 4294901760, %v603_v15  ;;  %v602_v53 = vmax.f32 %v593_v34, 0.0  ;;  %v3395_v34 = vsub.f32 %v1321_v18, %v3390_v27 }
 0x113   :  { %v3164_v56 = vsub.f32 %v603_v15, %v3161_v41  ;;  %v3166_v62 = vand.u32 4294901760, %v602_v53 }
 0x115   :  { %v720_v63 = vand.u32 4294901760, %v3164_v56  ;;  %v709_v0 = vsub.f32 %v602_v53, %v3166_v62  ;;  %2395 = vmatprep.mubr.f32.mxu1 %v3166_v62  ;;  %v1319_v53 = vld [vmem:[#allocation8 + $0x30] sm:$0xff] }
 0x116   :  { %2396 = vmatmul.mubr.f32.vlgmr.msra.gmra.mxu1 %v3161_v41 }
 0x117   :  { %2434 = vmatpush3.msra.mxu1 %v2951_v19  ;;  %v710_v52 = vand.u32 4294901760, %v709_v0  ;;  %v721_v22 = vsub.f32 %v3164_v56, %v720_v63 }
 0x118   :  { %2435 = vmatprep.subr.mxu1 %v2953_v25 }
 0x119   :  { %2436 = vmatpush3.msra.mxu1 %v2953_v25  ;;  %2465 = vmatprep.mubr.f32.mxu1 %v710_v52  ;;  %v711_v15 = vsub.f32 %v709_v0, %v710_v52  ;;  %v722_v57 = vand.u32 4294901760, %v721_v22  ;;  %v1318_v52 = vld [vmem:[#allocation8 + $0x28] sm:$0xff] }
 0x11a   :  { %2437 = vmatprep.subr.mxu1 %v2958_v32 }
 0x11b   :  { %2438 = vmatpush3.msra.mxu1 %v2958_v32  ;;  %v712_v29 = vand.u32 4294901760, %v711_v15 }
 0x11c   :  { %2439 = vmatprep.subr.mxu1 %v2963_v36 }
 0x11d   :  { %2440 = vmatpush3.msra.mxu1 %v2963_v36  ;;  %2360 = vmatprep.mubr.f32.mxu0 %v712_v29 }
 0x11e   :  { %2441 = vmatprep.subr.mxu1 %v2971_v40  ;;  %2361 = vmatmul.mubr.f32.vlgmr.msra.gmra.mxu0 %v722_v57  ;;  %v3419_v57 = vand.u32 4294901760, %v1318_v52 }
 0x11f   :  { %2399 = vmatpush3.msra.mxu0 %v2956_v31  ;;  %2442 = vmatpush3.msra.mxu1 %v2971_v40  ;;  %v3713_v31 = vld [vmem:[#allocation17_spill] sm:$0xff] }
 0x120   :  { %2400 = vmatprep.subr.mxu0 %v2961_v35  ;;  %2430 = vmatprep.mubr.f32.mxu0 %v709_v0  ;;  %v3407_v0 = vand.u32 4294901760, %v1319_v53 }
 0x121   :  { %2443 = vmatprep.subr.mxu1 %v2981_v44  ;;  %2401 = vmatpush3.msra.mxu0 %v2961_v35  ;;  %v3715_v35 = vld [vmem:[#allocation19_spill] sm:$0xff] }
 0x122   :  { %2444 = vmatpush3.msra.mxu1 %v2981_v44  ;;  %2402 = vmatprep.subr.mxu0 %v2969_v39  ;;  %v3417_v29 = vsub.f32 %v1319_v53, %v3407_v0 }
 0x123   :  { %2445 = vmatprep.subr.mxu1 %v2993_v48  ;;  %2403 = vmatpush3.msra.mxu0 %v2969_v39  ;;  %v3718_v39 = vld [vmem:[#allocation22_spill] sm:$0xff] }
 0x124   :  { %2446 = vmatpush3.msra.mxu1 %v2993_v48  ;;  %2404 = vmatprep.subr.mxu0 %v2979_v43 }
 0x125   :  { %2447 = vmatprep.subr.mxu1 %v3048_v5  ;;  %2405 = vmatpush3.msra.mxu0 %v2979_v43  ;;  %v1327_v43 = vld [vmem:[#allocation8 + $0x70] sm:$0xff] }
 0x126   :  { %2448 = vmatpush3.msra.mxu1 %v3048_v5  ;;  %2406 = vmatprep.subr.mxu0 %v2991_v47 }
 0x127   :  { %2449 = vmatprep.subr.mxu1 %v3053_v8  ;;  %2407 = vmatpush3.msra.mxu0 %v2991_v47  ;;  %v3310_v47 = vand.u32 4294901760, %v1327_v43 }
 0x128   :  { %2450 = vmatpush3.msra.mxu1 %v3053_v8  ;;  %2408 = vmatprep.subr.mxu0 %v3002_v51 }
 0x129   :  { %2451 = vmatprep.subr.mxu1 %v3063_v12  ;;  %2409 = vmatpush3.msra.mxu0 %v3002_v51  ;;  %v1324_v51 = vld [vmem:[#allocation8 + $0x58] sm:$0xff] }
 0x12a   :  { %2452 = vmatpush3.msra.mxu1 %v3063_v12  ;;  %2410 = vmatprep.subr.mxu0 %v3011_v55 }
 0x12b   :  { %2453 = vmatprep.subr.mxu1 %v3075_v17  ;;  %2411 = vmatpush3.msra.mxu0 %v3011_v55  ;;  %v1322_v55 = vld [vmem:[#allocation8 + $0x48] sm:$0xff] }
 0x12c   :  { %2454 = vmatpush3.msra.mxu1 %v3075_v17  ;;  %2412 = vmatprep.subr.mxu0 %v3051_v7 }
 0x12d   :  { %2455 = vmatprep.subr.mxu1 %v3088_v24  ;;  %2413 = vmatpush3.msra.mxu0 %v3051_v7  ;;  %v3324_v7 = vand.u32 4294901760, %v1322_v55 }
 0x12e   :  { %2456 = vmatpush3.msra.mxu1 %v3088_v24  ;;  %2414 = vmatprep.subr.mxu0 %v3061_v11 }
 0x12f   :  { %2457 = vmatprep.subr.mxu1 %v3096_v30  ;;  %2415 = vmatpush3.msra.mxu0 %v3061_v11 }
 0x130   :  { %2458 = vmatpush3.msra.mxu1 %v3096_v30  ;;  %2416 = vmatprep.subr.mxu0 %v3073_v16 }
 0x131   :  { %2459 = vmatprep.subr.mxu1 %v3107_v49  ;;  %2417 = vmatpush3.msra.mxu0 %v3073_v16 }
 0x132   :  { %2460 = vmatpush3.msra.mxu1 %v3107_v49  ;;  %2418 = vmatprep.subr.mxu0 %v3085_v23 }
 0x133   :  { %2461 = vmatprep.subr.mxu1 %v3120_v60  ;;  %2419 = vmatpush3.msra.mxu0 %v3085_v23 }
 0x134   :  { %2462 = vmatpush3.msra.mxu1 %v3120_v60  ;;  %2420 = vmatprep.subr.mxu0 %v3099_v33 }
 0x135   :  { %2463 = vmatprep.subr.mxu1 %v3134_v3  ;;  %2421 = vmatpush3.msra.mxu0 %v3099_v33 }
 0x136   :  { %2464 = vmatpush3.msra.mxu1 %v3134_v3  ;;  %2422 = vmatprep.subr.mxu0 %v3105_v45 }
 0x137   :  { %2466 = vmatmul.mubr.f32.vlgmr.msra.gmra.mxu1 %v720_v63  ;;  %2503 = vmatprep.subr.mxu1 %v2951_v19 }
 0x138   :  { %2423 = vmatpush3.msra.mxu0 %v3105_v45  ;;  %2504 = vmatpush3.msra.mxu1 %v2951_v19  ;;  %v3711_v19 = vld [vmem:[#allocation15_spill] sm:$0xff] }
 0x139   :  { %2535 = vmatprep.mubr.f32.mxu1 %v3166_v62  ;;  %2424 = vmatprep.subr.mxu0 %v3118_v59 }
 0x13a   :  { %2505 = vmatprep.subr.mxu1 %v2953_v25  ;;  %2425 = vmatpush3.msra.mxu0 %v3118_v59 }
 0x13b   :  { %2506 = vmatpush3.msra.mxu1 %v2953_v25  ;;  %2426 = vmatprep.subr.mxu0 %v3132_v2  ;;  %v3712_v25 = vld [vmem:[#allocation16_spill] sm:$0xff] }
 0x13c   :  { %2507 = vmatprep.subr.mxu1 %v2958_v32  ;;  %2427 = vmatpush3.msra.mxu0 %v3132_v2 }
 0x13d   :  { %2508 = vmatpush3.msra.mxu1 %v2958_v32  ;;  %2428 = vmatprep.subr.mxu0 %v3144_v14  ;;  %v3714_v32 = vld [vmem:[#allocation18_spill] sm:$0xff] }
 0x13e   :  { %2509 = vmatprep.subr.mxu1 %v2963_v36  ;;  %2429 = vmatpush3.msra.mxu0 %v3144_v14 }
 0x13f   :  { %2510 = vmatpush3.msra.mxu1 %v2963_v36  ;;  %2431 = vmatmul.mubr.f32.vlgmr.msra.gmra.mxu0 %v3164_v56  ;;  %v3716_v36 = vld [vmem:[#allocation20_spill] sm:$0xff] }
 0x140   :  { %2468 = vmatprep.subr.mxu0 %v2966_v38  ;;  %2511 = vmatprep.subr.mxu1 %v2971_v40 }
 0x141   :  { %2469 = vmatpush3.msra.mxu0 %v2966_v38  ;;  %2500 = vmatprep.mubr.f32.mxu0 %v3166_v62  ;;  %v3717_v38 = vld [vmem:[#allocation21_spill] sm:$0xff]  ;;  %v3402_v62 = vand.u32 4294901760, %v3395_v34 }
 0x142   :  { %2512 = vmatpush3.msra.mxu1 %v2971_v40  ;;  %2470 = vmatprep.subr.mxu0 %v2976_v42  ;;  %v1328_v40 = vld [vmem:[#allocation8 + $0x78] sm:$0xff] }
 0x143   :  { %2513 = vmatprep.subr.mxu1 %v2981_v44  ;;  %2471 = vmatpush3.msra.mxu0 %v2976_v42  ;;  %v3308_v42 = vand.u32 4294901760, %v1328_v40  ;;  %3719 = vst [vmem:[#allocation15_spill] sm:$0xff] %v3402_v62  ;;  %v1490_v22 = vsub.f32 %v3395_v34, %v3402_v62 }
 0x144   :  { %2514 = vmatpush3.msra.mxu1 %v2981_v44  ;;  %2472 = vmatprep.subr.mxu0 %v2988_v46  ;;  %v1326_v44 = vld [vmem:[#allocation8 + $0x68] sm:$0xff] }
 0x145   :  { %2515 = vmatprep.subr.mxu1 %v2993_v48  ;;  %2473 = vmatpush3.msra.mxu0 %v2988_v46  ;;  %v1325_v46 = vld [vmem:[#allocation8 + $0x60] sm:$0xff] }
 0x146   :  { %2516 = vmatpush3.msra.mxu1 %v2993_v48  ;;  %2474 = vmatprep.subr.mxu0 %v2999_v50  ;;  %v3312_v48 = vand.u32 4294901760, %v1326_v44 }
 0x147   :  { %2517 = vmatprep.subr.mxu1 %v3048_v5  ;;  %2475 = vmatpush3.msra.mxu0 %v2999_v50  ;;  %v3314_v50 = vand.u32 4294901760, %v1325_v46 }
 0x148   :  { %2518 = vmatpush3.msra.mxu1 %v3048_v5  ;;  %2476 = vmatprep.subr.mxu0 %v3008_v54 }
 0x149   :  { %2519 = vmatprep.subr.mxu1 %v3053_v8  ;;  %2477 = vmatpush3.msra.mxu0 %v3008_v54  ;;  %v1323_v54 = vld [vmem:[#allocation8 + $0x50] sm:$0xff]  ;;  %v3333_v11 = vsub.f32 %v1325_v46, %v3314_v50 }
 0x14a   :  { %2520 = vmatpush3.msra.mxu1 %v3053_v8  ;;  %2478 = vmatprep.subr.mxu0 %v3020_v58  ;;  %v3322_v5 = vand.u32 4294901760, %v1323_v54  ;;  %v3327_v8 = vsub.f32 %v1327_v43, %v3310_v47 }
 0x14b   :  { %2521 = vmatprep.subr.mxu1 %v3063_v12  ;;  %2479 = vmatpush3.msra.mxu0 %v3020_v58  ;;  %v3317_v58 = vsub.f32 %v1328_v40, %v3308_v42 }
 0x14c   :  { %2522 = vmatpush3.msra.mxu1 %v3063_v12  ;;  %2480 = vmatprep.subr.mxu0 %v3028_v61  ;;  %v3347_v23 = vand.u32 4294901760, %v3327_v8 }
 0x14d   :  { %2523 = vmatprep.subr.mxu1 %v3075_v17  ;;  %2481 = vmatpush3.msra.mxu0 %v3028_v61  ;;  %v3320_v61 = vand.u32 4294901760, %v1324_v51  ;;  %v3337_v12 = vand.u32 4294901760, %v3317_v58 }
 0x14e   :  { %2524 = vmatpush3.msra.mxu1 %v3075_v17  ;;  %2482 = vmatprep.subr.mxu0 %v3058_v10  ;;  %v3344_v17 = vsub.f32 %v1323_v54, %v3322_v5  ;;  %v1448_v59 = vsub.f32 %v3327_v8, %v3347_v23 }
 0x14f   :  { %2525 = vmatprep.subr.mxu1 %v3088_v24  ;;  %2483 = vmatpush3.msra.mxu0 %v3058_v10  ;;  %v3330_v10 = vsub.f32 %v1326_v44, %v3312_v48  ;;  %v3340_v16 = vsub.f32 %v1324_v51, %v3320_v61  ;;  %v1441_v33 = vsub.f32 %v3317_v58, %v3337_v12  ;;  %v1315_v51 = vld [vmem:[#allocation8 + $0x10] sm:$0xff] }
 0x150   :  { %2526 = vmatpush3.msra.mxu1 %v3088_v24  ;;  %2484 = vmatprep.subr.mxu0 %v3711_v19  ;;  %v1449_v13 = vand.u32 4294901760, %v1448_v59  ;;  %v3451_v59 = vand.u32 4294901760, %v1315_v51 }
 0x151   :  { %2527 = vmatprep.subr.mxu1 %v3096_v30  ;;  %2485 = vmatpush3.msra.mxu0 %v3711_v19  ;;  %v3350_v24 = vand.u32 4294901760, %v3330_v10  ;;  %v3359_v45 = vand.u32 4294901760, %v3340_v16  ;;  %v1442_v1 = vand.u32 4294901760, %v1441_v33  ;;  %v1317_v19 = vld [vmem:[#allocation8 + $0x20] sm:$0xff] }
 0x152   :  { %2528 = vmatpush3.msra.mxu1 %v3096_v30  ;;  %2486 = vmatprep.subr.mxu0 %v3712_v25  ;;  %v3353_v30 = vand.u32 4294901760, %v3333_v11 }
 0x153   :  { %2529 = vmatprep.subr.mxu1 %v3107_v49  ;;  %2487 = vmatpush3.msra.mxu0 %v3712_v25  ;;  %v1469_v21 = vsub.f32 %v3340_v16, %v3359_v45  ;;  %v1491_v25 = vand.u32 4294901760, %v1490_v22 }
 0x154   :  { %2530 = vmatpush3.msra.mxu1 %v3107_v49  ;;  %2488 = vmatprep.subr.mxu0 %v3713_v31  ;;  %v3363_v49 = vsub.f32 %v1322_v55, %v3324_v7  ;;  %v1462_v2 = vsub.f32 %v3333_v11, %v3353_v30 }
 0x155   :  { %2531 = vmatprep.subr.mxu1 %v3120_v60  ;;  %2489 = vmatpush3.msra.mxu0 %v3713_v31  ;;  %v1470_v20 = vand.u32 4294901760, %v1469_v21 }
 0x156   :  { %2532 = vmatpush3.msra.mxu1 %v3120_v60  ;;  %2490 = vmatprep.subr.mxu0 %v3714_v32  ;;  %v1455_v60 = vsub.f32 %v3330_v10, %v3350_v24  ;;  %v3380_v4 = vand.u32 4294901760, %v3363_v49  ;;  %v1463_v6 = vand.u32 4294901760, %v1462_v2 }
 0x157   :  { %2533 = vmatprep.subr.mxu1 %v3134_v3  ;;  %2491 = vmatpush3.msra.mxu0 %v3714_v32  ;;  %v3426_v32 = vand.u32 4294901760, %v3417_v29 }
 0x158   :  { %2534 = vmatpush3.msra.mxu1 %v3134_v3  ;;  %2492 = vmatprep.subr.mxu0 %v3715_v35  ;;  %v3373_v3 = vand.u32 4294901760, %v3344_v17  ;;  %v1456_v14 = vand.u32 4294901760, %v1455_v60  ;;  %v1483_v26 = vsub.f32 %v3363_v49, %v3380_v4 }
 0x159   :  { %2536 = vmatmul.mubr.f32.vlgmr.msra.gmra.mxu1 %v3161_v41  ;;  %2493 = vmatpush3.msra.mxu0 %v3715_v35  ;;  %3721 = vst [vmem:[#allocation17_spill] sm:$0xff] %v3426_v32  ;;  %v3429_v35 = vsub.f32 %v1318_v52, %v3419_v57  ;;  %v1504_v40 = vsub.f32 %v3417_v29, %v3426_v32 }
 0x15a   :  { %2494 = vmatprep.subr.mxu0 %v3716_v36  ;;  %2573 = vmatprep.subr.mxu1 %v1442_v1  ;;  %v1476_v9 = vsub.f32 %v3344_v17, %v3373_v3  ;;  %v1484_v56 = vand.u32 4294901760, %v1483_v26 }
 0x15b   :  { %2495 = vmatpush3.msra.mxu0 %v3716_v36  ;;  %2574 = vmatpush3.msra.mxu1 %v1442_v1  ;;  %v3432_v36 = vand.u32 4294901760, %v1317_v19  ;;  %v3438_v43 = vand.u32 4294901760, %v3429_v35  ;;  %v1505_v54 = vand.u32 4294901760, %v1504_v40  ;;  %v1314_v1 = vld [vmem:[#allocation8 + $0x8] sm:$0xff] }
 0x15c   :  { %2496 = vmatprep.subr.mxu0 %v3717_v38  ;;  %2575 = vmatprep.subr.mxu1 %v1449_v13  ;;  %v1477_v37 = vand.u32 4294901760, %v1476_v9  ;;  %v3464_v21 = vand.u32 4294901760, %v1314_v1  ;;  %v1313_v9 = vld [vmem:[#allocation8] sm:$0xff] }
 0x15d   :  { %2497 = vmatpush3.msra.mxu0 %v3717_v38  ;;  %2576 = vmatpush3.msra.mxu1 %v1449_v13  ;;  %v1316_v38 = vld [vmem:[#allocation8 + $0x18] sm:$0xff]  ;;  %3722 = vst [vmem:[#allocation18_spill] sm:$0xff] %v3438_v43  ;;  %v3443_v46 = vsub.f32 %v1317_v19, %v3432_v36  ;;  %v1511_v55 = vsub.f32 %v3429_v35, %v3438_v43 }
 0x15e   :  { %2498 = vmatprep.subr.mxu0 %v3718_v39  ;;  %2577 = vmatprep.subr.mxu1 %v1456_v14  ;;  %v3440_v44 = vand.u32 4294901760, %v1316_v38  ;;  %v3476_v26 = vsub.f32 %v1314_v1, %v3464_v21 }
 0x15f   :  { %2499 = vmatpush3.msra.mxu0 %v3718_v39  ;;  %2578 = vmatpush3.msra.mxu1 %v1456_v14  ;;  %v3455_v60 = vand.u32 4294901760, %v3443_v46  ;;  %v1512_v2 = vand.u32 4294901760, %v1511_v55  ;;  %v3462_v14 = vsub.f32 %v1315_v51, %v3451_v59 }
 0x160   :  { %2501 = vmatmul.mubr.f32.vlgmr.msra.gmra.mxu0 %v3161_v41  ;;  %2538 = vmatprep.subr.mxu0 %v3308_v42  ;;  %v3397_v41 = vand.u32 4294901760, %v1320_v28  ;;  %v3449_v33 = vsub.f32 %v1316_v38, %v3440_v44  ;;  %v3485_v52 = vand.u32 4294901760, %v3476_v26 }
 0x161   :  { %2539 = vmatpush3.msra.mxu0 %v3308_v42  ;;  %2579 = vmatprep.subr.mxu1 %v1463_v6  ;;  %3723 = vst [vmem:[#allocation19_spill] sm:$0xff] %v3455_v60 }
 0x162   :  { %2540 = vmatprep.subr.mxu0 %v3310_v47  ;;  %2580 = vmatpush3.msra.mxu1 %v1463_v6  ;;  %v3405_v63 = vsub.f32 %v1320_v28, %v3397_v41  ;;  %v3459_v13 = vand.u32 4294901760, %v3449_v33  ;;  %v1518_v6 = vsub.f32 %v3443_v46, %v3455_v60  ;;  %v3478_v28 = vand.u32 4294901760, %v1313_v9  ;;  %3726 = vst [vmem:[#allocation22_spill] sm:$0xff] %v3485_v52 }
 0x163   :  { %2541 = vmatpush3.msra.mxu0 %v3310_v47  ;;  %2581 = vmatprep.subr.mxu1 %v1470_v20 }
 0x164   :  { %2542 = vmatprep.subr.mxu0 %v3312_v48  ;;  %2582 = vmatpush3.msra.mxu1 %v1470_v20  ;;  %v3414_v15 = vand.u32 4294901760, %v3405_v63  ;;  %3724 = vst [vmem:[#allocation20_spill] sm:$0xff] %v3459_v13  ;;  %v1525_v18 = vsub.f32 %v3449_v33, %v3459_v13  ;;  %v3473_v20 = vand.u32 4294901760, %v3462_v14  ;;  %v3488_v22 = vsub.f32 %v1313_v9, %v3478_v28 }
 0x165   :  { %2543 = vmatpush3.msra.mxu0 %v3312_v48  ;;  %2583 = vmatprep.subr.mxu1 %v1477_v37 }
 0x166   :  { %2544 = vmatprep.subr.mxu0 %v3314_v50  ;;  %3720 = vst [vmem:[#allocation16_spill] sm:$0xff] %v3414_v15  ;;  %2584 = vmatpush3.msra.mxu1 %v1477_v37  ;;  %v1497_v31 = vsub.f32 %v3405_v63, %v3414_v15  ;;  %3725 = vst [vmem:[#allocation21_spill] sm:$0xff] %v3473_v20  ;;  %v1519_v37 = vand.u32 4294901760, %v1518_v6  ;;  %v1526_v53 = vand.u32 4294901760, %v1525_v18 }
 0x167   :  { %2545 = vmatpush3.msra.mxu0 %v3314_v50  ;;  %2585 = vmatprep.subr.mxu1 %v1484_v56 }
 0x168   :  { %2546 = vmatprep.subr.mxu0 %v3320_v61  ;;  %2586 = vmatpush3.msra.mxu1 %v1484_v56  ;;  %v1498_v39 = vand.u32 4294901760, %v1497_v31  ;;  %v1532_v56 = vsub.f32 %v3462_v14, %v3473_v20  ;;  %v3495_v31 = vand.u32 4294901760, %v3488_v22 }
 0x169   :  { %2547 = vmatpush3.msra.mxu0 %v3320_v61  ;;  %2587 = vmatprep.subr.mxu1 %v1491_v25 }
 0x16a   :  { %2548 = vmatprep.subr.mxu0 %v3322_v5  ;;  %2588 = vmatpush3.msra.mxu1 %v1491_v25  ;;  %v1533_v19 = vand.u32 4294901760, %v1532_v56  ;;  %v1539_v25 = vsub.f32 %v3476_v26, %v3485_v52  ;;  %3727 = vst [vmem:[#allocation23_spill] sm:$0xff] %v3495_v31 }
 0x16b   :  { %2549 = vmatpush3.msra.mxu0 %v3322_v5  ;;  %2589 = vmatprep.subr.mxu1 %v1498_v39 }
 0x16c   :  { %2550 = vmatprep.subr.mxu0 %v3324_v7  ;;  %2590 = vmatpush3.msra.mxu1 %v1498_v39  ;;  %v1540_v38 = vand.u32 4294901760, %v1539_v25  ;;  %v1546_v39 = vsub.f32 %v3488_v22, %v3495_v31 }
 0x16d   :  { %2551 = vmatpush3.msra.mxu0 %v3324_v7  ;;  %2591 = vmatprep.subr.mxu1 %v1505_v54 }
 0x16e   :  { %2552 = vmatprep.subr.mxu0 %v3390_v27  ;;  %2592 = vmatpush3.msra.mxu1 %v1505_v54  ;;  %v1547_v40 = vand.u32 4294901760, %v1546_v39  ;;  %v2044_v54 = vld [vmem:[%s3665_s4] ss:$0 sm:$0xff] }
 0x16f   :  { %2553 = vmatpush3.msra.mxu0 %v3390_v27  ;;  %2593 = vmatprep.subr.mxu1 %v1512_v2 }
 0x170   :  { %2554 = vmatprep.subr.mxu0 %v3397_v41  ;;  %2594 = vmatpush3.msra.mxu1 %v1512_v2 }
 0x171   :  { %2555 = vmatpush3.msra.mxu0 %v3397_v41  ;;  %2595 = vmatprep.subr.mxu1 %v1519_v37 }
 0x172   :  { %2556 = vmatprep.subr.mxu0 %v3407_v0  ;;  %2596 = vmatpush3.msra.mxu1 %v1519_v37 }
 0x173   :  { %2557 = vmatpush3.msra.mxu0 %v3407_v0  ;;  %2597 = vmatprep.subr.mxu1 %v1526_v53 }
 0x174   :  { %2558 = vmatprep.subr.mxu0 %v3419_v57  ;;  %2598 = vmatpush3.msra.mxu1 %v1526_v53 }
 0x175   :  { %2559 = vmatpush3.msra.mxu0 %v3419_v57  ;;  %2599 = vmatprep.subr.mxu1 %v1533_v19 }
 0x176   :  { %2560 = vmatprep.subr.mxu0 %v3432_v36  ;;  %2600 = vmatpush3.msra.mxu1 %v1533_v19 }
 0x177   :  { %2561 = vmatpush3.msra.mxu0 %v3432_v36  ;;  %2601 = vmatprep.subr.mxu1 %v1540_v38 }
 0x178   :  { %2562 = vmatprep.subr.mxu0 %v3440_v44  ;;  %2602 = vmatpush3.msra.mxu1 %v1540_v38 }
 0x179   :  { %2563 = vmatpush3.msra.mxu0 %v3440_v44  ;;  %2603 = vmatprep.subr.mxu1 %v1547_v40 }
 0x17a   :  { %2564 = vmatprep.subr.mxu0 %v3451_v59  ;;  %2604 = vmatpush3.msra.mxu1 %v1547_v40 }
 0x17b   :  { %2565 = vmatpush3.msra.mxu0 %v3451_v59  ;;  %2643 = vmatprep.subr.mxu1 %v3308_v42 }
 0x17c   :  { %2566 = vmatprep.subr.mxu0 %v3464_v21 }
 0x17d   :  { %2567 = vmatpush3.msra.mxu0 %v3464_v21 }
 0x17e   :  { %2568 = vmatprep.subr.mxu0 %v3478_v28 }
 0x17f   :  { %2569 = vmatpush3.msra.mxu0 %v3478_v28 }
 0x180   :  { %2608 = vmatprep.subr.mxu0 %v3317_v58 }
 0x1d6   :  { %v2397_v55 = vpop.f32.mrf.mxu1 }
 0x1d8   :  { %v875_v18 = vpop.f32.mrf.mxu1 }
 0x1de   :  { %v2362_v51 = vpop.f32.mrf.mxu0 }
 0x1df   :  { %v725_v2 = vadd.f32 %v2362_v51, %v2044_v54 }
 0x1e0   :  { %v714_v1 = vpop.f32.mrf.mxu0 }
 0x1e1   :  { %v715_v9 = vadd.f32 %v2044_v54, %v714_v1  ;;  %v882_v37 = vadd.f32 %v2397_v55, %v725_v2 }
 0x1e3   :  { %v876_v25 = vadd.f32 %v875_v18, %v715_v9 }
 0x1f7   :  { %v2467_v53 = vpop.f32.mrf.mxu1 }
 0x1f9   :  { %v1081_v39 = vpop.f32.mrf.mxu1 }
 0x1ff   :  { %v2432_v6 = vpop.f32.mrf.mxu0 }
 0x200   :  { %v993_v19 = vadd.f32 %v2432_v6, %v882_v37 }
 0x201   :  { %v985_v56 = vpop.f32.mrf.mxu0 }
 0x202   :  { %v986_v38 = vadd.f32 %v985_v56, %v876_v25  ;;  %v1090_v40 = vadd.f32 %v2467_v53, %v993_v19 }
 0x204   :  { %v1082_v13 = vadd.f32 %v1081_v39, %v986_v38 }
 0x219   :  { %v2537_v31 = vpop.f32.mrf.mxu1 }
 0x21b   :  { %v1301_v15 = vpop.f32.mrf.mxu1 }
 0x220   :  { %v2502_v52 = vpop.f32.mrf.mxu0 }
 0x221   :  { %v1215_v20 = vadd.f32 %v2502_v52, %v1090_v40 }
 0x222   :  { %v1208_v60 = vpop.f32.mrf.mxu0 }
 0x223   :  { %v1308_v43 = vadd.f32 %v2537_v31, %v1215_v20  ;;  %v1209_v32 = vadd.f32 %v1208_v60, %v1082_v13 }
 0x225   :  { %v1312_v51 = vmax.f32 %v1308_v43, 0.0  ;;  %v1302_v62 = vadd.f32 %v1301_v15, %v1209_v32 }
 0x227   :  { %v3505_v54 = vand.u32 4294901760, %v1312_v51  ;;  %v1311_v55 = vmax.f32 %v1302_v62, 0.0 }
 0x229   :  { %v3508_v1 = vsub.f32 %v1312_v51, %v3505_v54  ;;  %v3510_v2 = vand.u32 4294901760, %v1311_v55 }
 0x22b   :  { %v1429_v6 = vand.u32 4294901760, %v3508_v1  ;;  %v1418_v9 = vsub.f32 %v1311_v55, %v3510_v2  ;;  %2605 = vmatprep.mubr.f32.mxu1 %v3510_v2 }
 0x22c   :  { %2606 = vmatmul.mubr.f32.vlgmr.msra.gmra.mxu1 %v3505_v54 }
 0x22d   :  { %2644 = vmatpush3.msra.mxu1 %v3308_v42  ;;  %v1419_v43 = vand.u32 4294901760, %v1418_v9  ;;  %v1430_v62 = vsub.f32 %v3508_v1, %v1429_v6 }
 0x22e   :  { %2645 = vmatprep.subr.mxu1 %v3310_v47 }
 0x22f   :  { %2646 = vmatpush3.msra.mxu1 %v3310_v47  ;;  %2675 = vmatprep.mubr.f32.mxu1 %v1419_v43  ;;  %v1420_v15 = vsub.f32 %v1418_v9, %v1419_v43  ;;  %v1431_v60 = vand.u32 4294901760, %v1430_v62 }
 0x230   :  { %2647 = vmatprep.subr.mxu1 %v3312_v48 }
 0x231   :  { %2648 = vmatpush3.msra.mxu1 %v3312_v48  ;;  %v1421_v32 = vand.u32 4294901760, %v1420_v15 }
 0x232   :  { %2649 = vmatprep.subr.mxu1 %v3314_v50 }
 0x233   :  { %2650 = vmatpush3.msra.mxu1 %v3314_v50  ;;  %2570 = vmatprep.mubr.f32.mxu0 %v1421_v32 }
 0x234   :  { %2651 = vmatprep.subr.mxu1 %v3320_v61  ;;  %2571 = vmatmul.mubr.f32.vlgmr.msra.gmra.mxu0 %v1431_v60 }
 0x235   :  { %2609 = vmatpush3.msra.mxu0 %v3317_v58  ;;  %2652 = vmatpush3.msra.mxu1 %v3320_v61  ;;  %v3732_v58 = vld [vmem:[#allocation19_spill] sm:$0xff] }
 0x236   :  { %2610 = vmatprep.subr.mxu0 %v3327_v8  ;;  %2640 = vmatprep.mubr.f32.mxu0 %v1418_v9 }
 0x237   :  { %2653 = vmatprep.subr.mxu1 %v3322_v5  ;;  %2611 = vmatpush3.msra.mxu0 %v3327_v8  ;;  %v3736_v8 = vld [vmem:[#allocation23_spill] sm:$0xff] }
 0x238   :  { %2654 = vmatpush3.msra.mxu1 %v3322_v5  ;;  %2612 = vmatprep.subr.mxu0 %v3330_v10 }
 0x239   :  { %2655 = vmatprep.subr.mxu1 %v3324_v7  ;;  %2613 = vmatpush3.msra.mxu0 %v3330_v10 }
 0x23a   :  { %2656 = vmatpush3.msra.mxu1 %v3324_v7  ;;  %2614 = vmatprep.subr.mxu0 %v3333_v11 }
 0x23b   :  { %2657 = vmatprep.subr.mxu1 %v3390_v27  ;;  %2615 = vmatpush3.msra.mxu0 %v3333_v11  ;;  %v2045_v11 = vld [vmem:[%s3667_s6] ss:$0 sm:$0xff]  ;;  %s2869_s6 = smov [#allocation10]  }
 0x23c   :  { %2658 = vmatpush3.msra.mxu1 %v3390_v27  ;;  %2616 = vmatprep.subr.mxu0 %v3340_v16  ;;  %s2029_s23 = sshll.u32 %s2869_s6, 4  ;;  %s2030_s23 = int_to_ptr.vmem [resolvable:$true] %s2029_s23 }
 0x23d   :  { %2659 = vmatprep.subr.mxu1 %v3397_v41  ;;  %2617 = vmatpush3.msra.mxu0 %v3340_v16  ;;  %s2835_s24 = scalar_lea.vmem %s2030_s23, 256  ;;  %p2840_p7 = scmp.lt.s32.totalorder %s2030_s23, %s2030_s23 }
 0x23e   :  { %2660 = vmatpush3.msra.mxu1 %v3397_v41  ;;  %2618 = vmatprep.subr.mxu0 %v3344_v17  ;;  %p2836_p6 = scmp.ne.s32.totalorder %s2030_s23, %s2835_s24  ;;  %p2841_p8 = scmp.lt.s32.totalorder %s2835_s24, %s2835_s24 }
 0x23f   :  { %2661 = vmatprep.subr.mxu1 %v3407_v0  ;;  %2619 = vmatpush3.msra.mxu0 %v3344_v17 }
 0x240   :  { %2662 = vmatpush3.msra.mxu1 %v3407_v0  ;;  %2620 = vmatprep.subr.mxu0 %v3363_v49  ;;  %p2842_p9 = por %p2841_p8, %p2840_p7 }
 0x241   :  { %2663 = vmatprep.subr.mxu1 %v3419_v57  ;;  %2621 = vmatpush3.msra.mxu0 %v3363_v49 }
 0x242   :  { %2664 = vmatpush3.msra.mxu1 %v3419_v57  ;;  %2622 = vmatprep.subr.mxu0 %v3395_v34  ;;  %p2843_p10 = pnand %p2842_p9, %p2836_p6 }
 0x243   :  { %2665 = vmatprep.subr.mxu1 %v3432_v36  ;;  %2623 = vmatpush3.msra.mxu0 %v3395_v34 }
 0x244   :  { %2666 = vmatpush3.msra.mxu1 %v3432_v36  ;;  %2624 = vmatprep.subr.mxu0 %v3405_v63 }
 0x245   :  { %2667 = vmatprep.subr.mxu1 %v3440_v44  ;;  %2625 = vmatpush3.msra.mxu0 %v3405_v63 }
 0x246   :  { %2668 = vmatpush3.msra.mxu1 %v3440_v44  ;;  %2626 = vmatprep.subr.mxu0 %v3417_v29 }
 0x247   :  { %2669 = vmatprep.subr.mxu1 %v3451_v59  ;;  %2627 = vmatpush3.msra.mxu0 %v3417_v29 }
 0x248   :  { %2670 = vmatpush3.msra.mxu1 %v3451_v59  ;;  %2628 = vmatprep.subr.mxu0 %v3429_v35 }
 0x249   :  { %2671 = vmatprep.subr.mxu1 %v3464_v21  ;;  %2629 = vmatpush3.msra.mxu0 %v3429_v35 }
 0x24a   :  { %2672 = vmatpush3.msra.mxu1 %v3464_v21  ;;  %2630 = vmatprep.subr.mxu0 %v3443_v46 }
 0x24b   :  { %2673 = vmatprep.subr.mxu1 %v3478_v28  ;;  %2631 = vmatpush3.msra.mxu0 %v3443_v46 }
 0x24c   :  { %2674 = vmatpush3.msra.mxu1 %v3478_v28  ;;  %2632 = vmatprep.subr.mxu0 %v3449_v33 }
 0x24d   :  { %2676 = vmatmul.mubr.f32.vlgmr.msra.gmra.mxu1 %v1429_v6  ;;  %2713 = vmatprep.subr.mxu1 %v3308_v42 }
 0x24e   :  { %2633 = vmatpush3.msra.mxu0 %v3449_v33  ;;  %2714 = vmatpush3.msra.mxu1 %v3308_v42  ;;  %v3728_v42 = vld [vmem:[#allocation15_spill] sm:$0xff] }
 0x24f   :  { %2745 = vmatprep.mubr.f32.mxu1 %v3510_v2  ;;  %2634 = vmatprep.subr.mxu0 %v3462_v14 }
 0x250   :  { %2715 = vmatprep.subr.mxu1 %v3310_v47  ;;  %2635 = vmatpush3.msra.mxu0 %v3462_v14 }
 0x251   :  { %2716 = vmatpush3.msra.mxu1 %v3310_v47  ;;  %2636 = vmatprep.subr.mxu0 %v3476_v26  ;;  %v3729_v47 = vld [vmem:[#allocation16_spill] sm:$0xff] }
 0x252   :  { %2717 = vmatprep.subr.mxu1 %v3312_v48  ;;  %2637 = vmatpush3.msra.mxu0 %v3476_v26 }
 0x253   :  { %2718 = vmatpush3.msra.mxu1 %v3312_v48  ;;  %2638 = vmatprep.subr.mxu0 %v3488_v22  ;;  %v3730_v48 = vld [vmem:[#allocation17_spill] sm:$0xff] }
 0x254   :  { %2719 = vmatprep.subr.mxu1 %v3314_v50  ;;  %2639 = vmatpush3.msra.mxu0 %v3488_v22 }
 0x255   :  { %2720 = vmatpush3.msra.mxu1 %v3314_v50  ;;  %2641 = vmatmul.mubr.f32.vlgmr.msra.gmra.mxu0 %v3508_v1  ;;  %v3731_v50 = vld [vmem:[#allocation18_spill] sm:$0xff] }
 0x256   :  { %2678 = vmatprep.subr.mxu0 %v3337_v12  ;;  %2721 = vmatprep.subr.mxu1 %v3320_v61 }
 0x257   :  { %2679 = vmatpush3.msra.mxu0 %v3337_v12  ;;  %2710 = vmatprep.mubr.f32.mxu0 %v3510_v2 }
 0x258   :  { %2722 = vmatpush3.msra.mxu1 %v3320_v61  ;;  %2680 = vmatprep.subr.mxu0 %v3347_v23  ;;  %v3733_v61 = vld [vmem:[#allocation20_spill] sm:$0xff] }
 0x259   :  { %2723 = vmatprep.subr.mxu1 %v3322_v5  ;;  %2681 = vmatpush3.msra.mxu0 %v3347_v23 }
 0x25a   :  { %2724 = vmatpush3.msra.mxu1 %v3322_v5  ;;  %2682 = vmatprep.subr.mxu0 %v3350_v24  ;;  %v3734_v5 = vld [vmem:[#allocation21_spill] sm:$0xff] }
 0x25b   :  { %2725 = vmatprep.subr.mxu1 %v3324_v7  ;;  %2683 = vmatpush3.msra.mxu0 %v3350_v24 }
 0x25c   :  { %2726 = vmatpush3.msra.mxu1 %v3324_v7  ;;  %2684 = vmatprep.subr.mxu0 %v3353_v30  ;;  %v3735_v7 = vld [vmem:[#allocation22_spill] sm:$0xff] }
 0x25d   :  { %2727 = vmatprep.subr.mxu1 %v3390_v27  ;;  %2685 = vmatpush3.msra.mxu0 %v3353_v30 }
 0x25e   :  { %2728 = vmatpush3.msra.mxu1 %v3390_v27  ;;  %2686 = vmatprep.subr.mxu0 %v3359_v45 }
 0x25f   :  { %2729 = vmatprep.subr.mxu1 %v3397_v41  ;;  %2687 = vmatpush3.msra.mxu0 %v3359_v45 }
 0x260   :  { %2730 = vmatpush3.msra.mxu1 %v3397_v41  ;;  %2688 = vmatprep.subr.mxu0 %v3373_v3 }
 0x261   :  { %2731 = vmatprep.subr.mxu1 %v3407_v0  ;;  %2689 = vmatpush3.msra.mxu0 %v3373_v3 }
 0x262   :  { %2732 = vmatpush3.msra.mxu1 %v3407_v0  ;;  %2690 = vmatprep.subr.mxu0 %v3380_v4 }
 0x263   :  { %2733 = vmatprep.subr.mxu1 %v3419_v57  ;;  %2691 = vmatpush3.msra.mxu0 %v3380_v4 }
 0x264   :  { %2734 = vmatpush3.msra.mxu1 %v3419_v57  ;;  %2692 = vmatprep.subr.mxu0 %v3728_v42 }
 0x265   :  { %2735 = vmatprep.subr.mxu1 %v3432_v36  ;;  %2693 = vmatpush3.msra.mxu0 %v3728_v42 }
 0x266   :  { %2736 = vmatpush3.msra.mxu1 %v3432_v36  ;;  %2694 = vmatprep.subr.mxu0 %v3729_v47 }
 0x267   :  { %2737 = vmatprep.subr.mxu1 %v3440_v44  ;;  %2695 = vmatpush3.msra.mxu0 %v3729_v47 }
 0x268   :  { %2738 = vmatpush3.msra.mxu1 %v3440_v44  ;;  %2696 = vmatprep.subr.mxu0 %v3730_v48 }
 0x269   :  { %2739 = vmatprep.subr.mxu1 %v3451_v59  ;;  %2697 = vmatpush3.msra.mxu0 %v3730_v48 }
 0x26a   :  { %2740 = vmatpush3.msra.mxu1 %v3451_v59  ;;  %2698 = vmatprep.subr.mxu0 %v3731_v50 }
 0x26b   :  { %2741 = vmatprep.subr.mxu1 %v3464_v21  ;;  %2699 = vmatpush3.msra.mxu0 %v3731_v50 }
 0x26c   :  { %2742 = vmatpush3.msra.mxu1 %v3464_v21  ;;  %2700 = vmatprep.subr.mxu0 %v3732_v58 }
 0x26d   :  { %2743 = vmatprep.subr.mxu1 %v3478_v28  ;;  %2701 = vmatpush3.msra.mxu0 %v3732_v58 }
 0x26e   :  { %2744 = vmatpush3.msra.mxu1 %v3478_v28  ;;  %2702 = vmatprep.subr.mxu0 %v3733_v61 }
 0x26f   :  { %2746 = vmatmul.mubr.f32.vlgmr.msra.gmra.mxu1 %v3505_v54  ;;  %2703 = vmatpush3.msra.mxu0 %v3733_v61 }
 0x270   :  { %2704 = vmatprep.subr.mxu0 %v3734_v5 }
 0x271   :  { %2705 = vmatpush3.msra.mxu0 %v3734_v5 }
 0x272   :  { %2706 = vmatprep.subr.mxu0 %v3735_v7 }
 0x273   :  { %2707 = vmatpush3.msra.mxu0 %v3735_v7 }
 0x274   :  { %2708 = vmatprep.subr.mxu0 %v3736_v8 }
 0x275   :  { %2709 = vmatpush3.msra.mxu0 %v3736_v8 }
 0x276   :  { %2711 = vmatmul.mubr.f32.vlgmr.msra.gmra.mxu0 %v3505_v54 }
 0x2ec   :  { %v2607_v12 = vpop.f32.mrf.mxu1 }
 0x2ee   :  { %v1584_v30 = vpop.f32.mrf.mxu1 }
 0x2f4   :  { %v2572_v10 = vpop.f32.mrf.mxu0 }
 0x2f5   :  { %v1434_v17 = vadd.f32 %v2572_v10, %v2045_v11 }
 0x2f6   :  { %v1423_v16 = vpop.f32.mrf.mxu0 }
 0x2f7   :  { %v1424_v24 = vadd.f32 %v2045_v11, %v1423_v16  ;;  %v1591_v45 = vadd.f32 %v2607_v12, %v1434_v17 }
 0x2f9   :  { %v1585_v27 = vadd.f32 %v1584_v30, %v1424_v24 }
 0x30d   :  { %v2677_v49 = vpop.f32.mrf.mxu1 }
 0x30f   :  { %v1790_v41 = vpop.f32.mrf.mxu1 }
 0x315   :  { %v2642_v23 = vpop.f32.mrf.mxu0 }
 0x316   :  { %v1702_v4 = vadd.f32 %v2642_v23, %v1591_v45 }
 0x317   :  { %v1694_v3 = vpop.f32.mrf.mxu0 }
 0x318   :  { %v1695_v34 = vadd.f32 %v1694_v3, %v1585_v27  ;;  %v1799_v63 = vadd.f32 %v2677_v49, %v1702_v4 }
 0x31a   :  { %v1791_v35 = vadd.f32 %v1790_v41, %v1695_v34 }
 0x32f   :  { %v2747_v0 = vpop.f32.mrf.mxu1 }
 0x331   :  { %v2010_v33 = vpop.f32.mrf.mxu1 }
 0x336   :  { %v2712_v29 = vpop.f32.mrf.mxu0 }
 0x337   :  { %v1924_v57 = vadd.f32 %v2712_v29, %v1799_v63 }
 0x338   :  { %v1917_v36 = vpop.f32.mrf.mxu0 }
 0x339   :  { %v2017_v44 = vadd.f32 %v2747_v0, %v1924_v57  ;;  %v1918_v46 = vadd.f32 %v1917_v36, %v1791_v35 }
 0x33b   :  { %v2021_v59 = vmax.f32 %v2017_v44, 0.0  ;;  %v2011_v13 = vadd.f32 %v2010_v33, %v1918_v46 }
 0x33d   :  { %2023 = vst [vmem:[#allocation10 + $0x8] sm:$0xff] %v2021_v59  ;;  %v2020_v14 = vmax.f32 %v2011_v13, 0.0 }
 0x33f   :  { %2022 = vst [vmem:[#allocation10] sm:$0xff] %v2020_v14 }
 0x340   :  { %2846 = shalt.err (!%p2843_p10)
}
 0x341   :  { %2035 = dma.vmem_to_hbm [thread:$0]  %s2030_s23, 256, %s3668_s7, [#allocation4], %s2865_s29, %s2865_s29, %s2866_s30  }
 0x342   :  { %2861 = dma.done.wait [#allocation4], 256  }
 0x343   :  { %2862 = vsyncadd [#allocation4], 4294967040 }
 0x344   :  { %2039 = vsyncpa [#allocation3], 1 }
 0x345   :  { %2040 = vsyncpa [#allocation6], 1 }
 0x346   :  { %2041 = vsyncpa [#allocation9], 1 }
 0x347   :  { %2042 = vsyncpa [#allocation4], 1 }

</bundles_post_ra>
